<compile_context>
chip_gen: v7x
topology: tpu7x:2x2x1
jax: 0.10.0
libtpu: 0.0.40
codegen_flags: <defaults>
</compile_context>

<pallas_src>
import math

import jax
import jax.numpy as jnp
from jax.experimental import pallas as pl
from jax.experimental.pallas import tpu as pltpu

# ----------------------------- model dims ---------------------------------
B = 2          # batch
S = 8          # src sequence length
SB = 8         # bert_out sequence length (must equal S: src_mask masks bert keys)
D = 32         # d_model
H = 4          # attention heads
DH = D // H    # head dim
DFF = 64       # feed-forward hidden
N_LAYERS = 2   # config.n_layers
EPS = 1e-5     # nn.LayerNorm default

assert SB == S, "reference module applies src_mask to bert_out keys -> SB must equal S"


# ------------------------- fused per-batch encoder kernel ------------------
def _encoder_kernel(
    src_ref, bert_ref, mask_ref,
    w_qkv_ref, b_qkv_ref, w_o_ref, b_o_ref,
    w_cq_ref, b_cq_ref, w_ckv_ref, b_ckv_ref, w_co_ref, b_co_ref,
    w_f1_ref, b_f1_ref, w_f2_ref, b_f2_ref,
    ln_g_ref, ln_b_ref,
    out_ref,
):
    # Per-grid-step blocks: src (1,S,D), bert (1,SB,D), mask (1,1,S).
    x = src_ref[...].reshape(S, D).astype(jnp.float32)

    # additive mask bias computed once: 0 where keep, -1e9 where padded.
    # Shape (1,1,Sk) broadcasts over the [H, Q, Sk] score slab.
    mask_bias = (mask_ref[...].astype(jnp.float32) - 1.0) * 1e9

    # LayerNorm gamma/beta rows sliced ONCE (not re-sliced per unrolled layer).
    ln_g = ln_g_ref[...]
    ln_b = ln_b_ref[...]
    g0, g1, g2 = ln_g[0:1, :], ln_g[1:2, :], ln_g[2:3, :]
    bb0, bb1, bb2 = ln_b[0:1, :], ln_b[1:2, :], ln_b[2:3, :]

    scale = 1.0 / math.sqrt(DH)

    def layer_norm(v, g, b):
        mu = jnp.mean(v, axis=-1, keepdims=True)
        var = jnp.mean((v - mu) * (v - mu), axis=-1, keepdims=True)
        return (v - mu) * jax.lax.rsqrt(var + EPS) * g + b

    def split_heads(slab_bf, off):
        # [seq, >=off+D] -> [H, seq, DH] using only static lane slices and a
        # leading-dim stack (no lane-dim reshape / relayout).
        return jnp.stack(
            [slab_bf[:, off + h * DH: off + (h + 1) * DH] for h in range(H)],
            axis=0)

    def attend(qh, kh, vh, w_out_ref, b_out_ref):
        # qh: [H,S,DH] bf16, kh/vh: [H,Sk,DH] bf16.
        # One batched score matmul + ONE softmax pass over the whole slab.
        s = jnp.einsum("hqd,hkd->hqk", qh, kh,
                       preferred_element_type=jnp.float32) * scale
        s = s + mask_bias
        m = jnp.max(s, axis=-1, keepdims=True)
        p = jnp.exp(s - m)
        p = p * pl.reciprocal(jnp.sum(p, axis=-1, keepdims=True), approx=True)
        ctx = jnp.einsum("hqk,hkd->hqd", p.astype(jnp.bfloat16), vh,
                         preferred_element_type=jnp.float32)        # [H,S,DH]
        # merge heads (lane concat) + ONE fused output-projection matmul
        ctx_all = jnp.concatenate([ctx[h] for h in range(H)], axis=-1)  # [S,D]
        return (jnp.dot(ctx_all.astype(jnp.bfloat16), w_out_ref[...],
                        preferred_element_type=jnp.float32)
                + b_out_ref[...])

    # Cross-attention K/V of bert_out: shared weights + constant input ->
    # identical for every layer; compute + head-split once, outside the loop.
    bert_bf = bert_ref[...].reshape(SB, D).astype(jnp.bfloat16)
    kv_c = (jnp.dot(bert_bf, w_ckv_ref[...], preferred_element_type=jnp.float32)
            + b_ckv_ref[...]).astype(jnp.bfloat16)
    kh_c = split_heads(kv_c, 0)
    vh_c = split_heads(kv_c, D)

    # n_layers applications of the SAME shared layer, all in-kernel.
    for _ in range(N_LAYERS):
        # --- masked self-attention (+ residual + LN) ---
        qkv = (jnp.dot(x.astype(jnp.bfloat16), w_qkv_ref[...],
                       preferred_element_type=jnp.float32)
               + b_qkv_ref[...]).astype(jnp.bfloat16)
        sa = attend(split_heads(qkv, 0), split_heads(qkv, D),
                    split_heads(qkv, 2 * D), w_o_ref, b_o_ref)
        x = layer_norm(x + sa, g0, bb0)

        # --- cross-attention to bert_out (+ residual + LN) ---
        # TODO(synk): reference semantics mask bert keys with src_mask (SB == S).
        qc = (jnp.dot(x.astype(jnp.bfloat16), w_cq_ref[...],
                      preferred_element_type=jnp.float32)
              + b_cq_ref[...]).astype(jnp.bfloat16)
        ca = attend(split_heads(qc, 0), kh_c, vh_c, w_co_ref, b_co_ref)
        x = layer_norm(x + ca, g1, bb1)

        # --- position-wise feed-forward (+ residual + LN) ---
        h1 = jnp.maximum(
            jnp.dot(x.astype(jnp.bfloat16), w_f1_ref[...],
                    preferred_element_type=jnp.float32) + b_f1_ref[...], 0.0)
        ff = (jnp.dot(h1.astype(jnp.bfloat16), w_f2_ref[...],
                      preferred_element_type=jnp.float32) + b_f2_ref[...])
        x = layer_norm(x + ff, g2, bb2)

    out_ref[...] = x.reshape(1, S, D).astype(out_ref.dtype)


def encoder_forward(src, bert_out, src_mask, params):
    """One pallas_call for the whole Encoder.forward, gridded over batch."""
    mask3d = src_mask.reshape(B, 1, S).astype(jnp.float32)

    # Matmul weights go in as bf16 (MXU-native everywhere); biases/LN stay f32.
    def wb(name):
        return params[name].astype(jnp.bfloat16)

    def w_spec(shape):
        return pl.BlockSpec(shape, lambda b: (0, 0))   # full-block, shared

    in_specs = [
        pl.BlockSpec((1, S, D), lambda b: (b, 0, 0)),    # src
        pl.BlockSpec((1, SB, D), lambda b: (b, 0, 0)),   # bert_out
        pl.BlockSpec((1, 1, S), lambda b: (b, 0, 0)),    # mask
        w_spec((D, 3 * D)), w_spec((1, 3 * D)),          # w_qkv, b_qkv
        w_spec((D, D)), w_spec((1, D)),                  # w_o, b_o
        w_spec((D, D)), w_spec((1, D)),                  # w_cq, b_cq
        w_spec((D, 2 * D)), w_spec((1, 2 * D)),          # w_ckv, b_ckv
        w_spec((D, D)), w_spec((1, D)),                  # w_co, b_co
        w_spec((D, DFF)), w_spec((1, DFF)),              # w_f1, b_f1
        w_spec((DFF, D)), w_spec((1, D)),                # w_f2, b_f2
        w_spec((3, D)), w_spec((3, D)),                  # ln_g, ln_b
    ]

    return pl.pallas_call(
        _encoder_kernel,
        out_shape=jax.ShapeDtypeStruct((B, S, D), src.dtype),
        grid=(B,),
        in_specs=in_specs,
        out_specs=pl.BlockSpec((1, S, D), lambda b: (b, 0, 0)),
        compiler_params=pltpu.CompilerParams(
            dimension_semantics=("parallel",)),
    )(
        src, bert_out, mask3d,
        wb("w_qkv"), params["b_qkv"], wb("w_o"), params["b_o"],
        wb("w_cq"), params["b_cq"], wb("w_ckv"), params["b_ckv"],
        wb("w_co"), params["b_co"],
        wb("w_f1"), params["b_f1"], wb("w_f2"), params["b_f2"],
        params["ln_g"], params["ln_b"],
    )


# ----------------------------- parameter init ------------------------------
def init_params(key):
    ks = jax.random.split(key, 7)

    def w(k, shape):
        return 0.02 * jax.random.normal(k, shape, jnp.float32)

    return {
        # self-attention: fused Q|K|V projection, output projection
        "w_qkv": w(ks[0], (D, 3 * D)), "b_qkv": jnp.zeros((1, 3 * D), jnp.float32),
        "w_o": w(ks[1], (D, D)),       "b_o": jnp.zeros((1, D), jnp.float32),
        # cross-attention: Q from src, fused K|V from bert_out, output proj
        "w_cq": w(ks[2], (D, D)),      "b_cq": jnp.zeros((1, D), jnp.float32),
        "w_ckv": w(ks[3], (D, 2 * D)), "b_ckv": jnp.zeros((1, 2 * D), jnp.float32),
        "w_co": w(ks[4], (D, D)),      "b_co": jnp.zeros((1, D), jnp.float32),
        # feed-forward
        "w_f1": w(ks[5], (D, DFF)),    "b_f1": jnp.zeros((1, DFF), jnp.float32),
        "w_f2": w(ks[6], (DFF, D)),    "b_f2": jnp.zeros((1, D), jnp.float32),
        # the three LayerNorms (gamma rows / beta rows)
        "ln_g": jnp.ones((3, D), jnp.float32),
        "ln_b": jnp.zeros((3, D), jnp.float32),
    }


# --------------------------------- main ------------------------------------
if __name__ == "__main__":
    key = jax.random.PRNGKey(0)
    k_src, k_bert, k_params = jax.random.split(key, 3)

    src = jax.random.normal(k_src, (B, S, D), jnp.float32)
    bert_out = jax.random.normal(k_bert, (B, SB, D), jnp.float32)
    # src_mask in the usual PyTorch convention: [B, 1, 1, S], 1 = keep, 0 = pad.
    src_mask = jnp.ones((B, 1, 1, S), jnp.float32)
    src_mask = src_mask.at[1, :, :, -2:].set(0.0)  # pad out last 2 tokens of batch 1

    params = init_params(k_params)

    fwd = jax.jit(encoder_forward)
    out = jax.block_until_ready(fwd(src, bert_out, src_mask, params))

    assert out.shape == (B, S, D)
    assert bool(jnp.all(jnp.isfinite(out)))
    print("KERNEL_OK")
</pallas_src>

<mosaic_0001>
module attributes {stable_mosaic.version = 11 : i64} {
  func.func @_encoder_kernel(%arg0: i32, %arg1: memref<1x8x32xf32, #tpu.memory_space<vmem>>, %arg2: memref<1x8x32xf32, #tpu.memory_space<vmem>>, %arg3: memref<1x1x8xf32, #tpu.memory_space<vmem>>, %arg4: memref<32x96xbf16, #tpu.memory_space<vmem>>, %arg5: memref<1x96xf32, #tpu.memory_space<vmem>>, %arg6: memref<32x32xbf16, #tpu.memory_space<vmem>>, %arg7: memref<1x32xf32, #tpu.memory_space<vmem>>, %arg8: memref<32x32xbf16, #tpu.memory_space<vmem>>, %arg9: memref<1x32xf32, #tpu.memory_space<vmem>>, %arg10: memref<32x64xbf16, #tpu.memory_space<vmem>>, %arg11: memref<1x64xf32, #tpu.memory_space<vmem>>, %arg12: memref<32x32xbf16, #tpu.memory_space<vmem>>, %arg13: memref<1x32xf32, #tpu.memory_space<vmem>>, %arg14: memref<32x64xbf16, #tpu.memory_space<vmem>>, %arg15: memref<1x64xf32, #tpu.memory_space<vmem>>, %arg16: memref<64x32xbf16, #tpu.memory_space<vmem>>, %arg17: memref<1x32xf32, #tpu.memory_space<vmem>>, %arg18: memref<3x32xf32, #tpu.memory_space<vmem>>, %arg19: memref<3x32xf32, #tpu.memory_space<vmem>>, %arg20: memref<1x8x32xf32, #tpu.memory_space<vmem>>) attributes {dimension_semantics = [#tpu.dimension_semantics<parallel>], iteration_bounds = array<i64: 2>, scalar_prefetch = 0 : i64, scratch_operands = 0 : i64, tpu.core_type = #tpu.core_type<tc>, window_params = [{transform_indices = @transform_0, window_bounds = array<i64: 1, 8, 32>}, {transform_indices = @transform_1, window_bounds = array<i64: 1, 8, 32>}, {transform_indices = @transform_2, window_bounds = array<i64: 1, 1, 8>}, {pipeline_mode = #tpu.pipeline_mode<synchronous>, transform_indices = @transform_3, window_bounds = array<i64: 32, 96>}, {pipeline_mode = #tpu.pipeline_mode<synchronous>, transform_indices = @transform_4, window_bounds = array<i64: 1, 96>}, {pipeline_mode = #tpu.pipeline_mode<synchronous>, transform_indices = @transform_5, window_bounds = array<i64: 32, 32>}, {pipeline_mode = #tpu.pipeline_mode<synchronous>, transform_indices = @transform_6, window_bounds = array<i64: 1, 32>}, {pipeline_mode = #tpu.pipeline_mode<synchronous>, transform_indices = @transform_7, window_bounds = array<i64: 32, 32>}, {pipeline_mode = #tpu.pipeline_mode<synchronous>, transform_indices = @transform_8, window_bounds = array<i64: 1, 32>}, {pipeline_mode = #tpu.pipeline_mode<synchronous>, transform_indices = @transform_9, window_bounds = array<i64: 32, 64>}, {pipeline_mode = #tpu.pipeline_mode<synchronous>, transform_indices = @transform_10, window_bounds = array<i64: 1, 64>}, {pipeline_mode = #tpu.pipeline_mode<synchronous>, transform_indices = @transform_11, window_bounds = array<i64: 32, 32>}, {pipeline_mode = #tpu.pipeline_mode<synchronous>, transform_indices = @transform_12, window_bounds = array<i64: 1, 32>}, {pipeline_mode = #tpu.pipeline_mode<synchronous>, transform_indices = @transform_13, window_bounds = array<i64: 32, 64>}, {pipeline_mode = #tpu.pipeline_mode<synchronous>, transform_indices = @transform_14, window_bounds = array<i64: 1, 64>}, {pipeline_mode = #tpu.pipeline_mode<synchronous>, transform_indices = @transform_15, window_bounds = array<i64: 64, 32>}, {pipeline_mode = #tpu.pipeline_mode<synchronous>, transform_indices = @transform_16, window_bounds = array<i64: 1, 32>}, {pipeline_mode = #tpu.pipeline_mode<synchronous>, transform_indices = @transform_17, window_bounds = array<i64: 3, 32>}, {pipeline_mode = #tpu.pipeline_mode<synchronous>, transform_indices = @transform_18, window_bounds = array<i64: 3, 32>}, {transform_indices = @transform_19, window_bounds = array<i64: 1, 8, 32>}]} {
    %c0 = arith.constant 0 : index
    %c0_0 = arith.constant 0 : index
    %c0_1 = arith.constant 0 : index
    %0 = vector.load %arg1[%c0, %c0_0, %c0_1] : memref<1x8x32xf32, #tpu.memory_space<vmem>>, vector<1x8x32xf32>
    %1 = vector.shape_cast %0 : vector<1x8x32xf32> to vector<8x32xf32>
    %c0_2 = arith.constant 0 : index
    %c0_3 = arith.constant 0 : index
    %c0_4 = arith.constant 0 : index
    %2 = vector.load %arg3[%c0_2, %c0_3, %c0_4] : memref<1x1x8xf32, #tpu.memory_space<vmem>>, vector<1x1x8xf32>
    %cst = arith.constant 1.000000e+00 : f32
    %3 = vector.broadcast %cst : f32 to vector<1x1x8xf32>
    %4 = arith.subf %2, %3 : vector<1x1x8xf32>
    %cst_5 = arith.constant 1.000000e+09 : f32
    %5 = vector.broadcast %cst_5 : f32 to vector<1x1x8xf32>
    %6 = arith.mulf %4, %5 : vector<1x1x8xf32>
    %c0_6 = arith.constant 0 : index
    %c0_7 = arith.constant 0 : index
    %7 = vector.load %arg18[%c0_6, %c0_7] : memref<3x32xf32, #tpu.memory_space<vmem>>, vector<3x32xf32>
    %c0_8 = arith.constant 0 : index
    %c0_9 = arith.constant 0 : index
    %8 = vector.load %arg19[%c0_8, %c0_9] : memref<3x32xf32, #tpu.memory_space<vmem>>, vector<3x32xf32>
    %9 = vector.extract_strided_slice %7 {offsets = [0, 0], sizes = [1, 32], strides = [1, 1]} : vector<3x32xf32> to vector<1x32xf32>
    %10 = vector.extract_strided_slice %7 {offsets = [1, 0], sizes = [1, 32], strides = [1, 1]} : vector<3x32xf32> to vector<1x32xf32>
    %11 = vector.extract_strided_slice %7 {offsets = [2, 0], sizes = [1, 32], strides = [1, 1]} : vector<3x32xf32> to vector<1x32xf32>
    %12 = vector.extract_strided_slice %8 {offsets = [0, 0], sizes = [1, 32], strides = [1, 1]} : vector<3x32xf32> to vector<1x32xf32>
    %13 = vector.extract_strided_slice %8 {offsets = [1, 0], sizes = [1, 32], strides = [1, 1]} : vector<3x32xf32> to vector<1x32xf32>
    %14 = vector.extract_strided_slice %8 {offsets = [2, 0], sizes = [1, 32], strides = [1, 1]} : vector<3x32xf32> to vector<1x32xf32>
    %c0_10 = arith.constant 0 : index
    %c0_11 = arith.constant 0 : index
    %c0_12 = arith.constant 0 : index
    %15 = vector.load %arg2[%c0_10, %c0_11, %c0_12] : memref<1x8x32xf32, #tpu.memory_space<vmem>>, vector<1x8x32xf32>
    %16 = vector.shape_cast %15 : vector<1x8x32xf32> to vector<8x32xf32>
    %17 = arith.truncf %16 : vector<8x32xf32> to vector<8x32xbf16>
    %c0_13 = arith.constant 0 : index
    %c0_14 = arith.constant 0 : index
    %18 = vector.load %arg10[%c0_13, %c0_14] : memref<32x64xbf16, #tpu.memory_space<vmem>>, vector<32x64xbf16>
    %cst_15 = arith.constant dense<0.000000e+00> : vector<8x64xf32>
    %19 = tpu.matmul %17, %18, %cst_15 {dimension_numbers = #tpu.dot_dimension_numbers<[1], [0], [0], [1], [0, 0, 1, 1], [], []>} : vector<8x32xbf16>, vector<32x64xbf16>, vector<8x64xf32> -> vector<8x64xf32>
    %c0_16 = arith.constant 0 : index
    %c0_17 = arith.constant 0 : index
    %20 = vector.load %arg11[%c0_16, %c0_17] : memref<1x64xf32, #tpu.memory_space<vmem>>, vector<1x64xf32>
    %21 = vector.broadcast %20 : vector<1x64xf32> to vector<8x64xf32>
    %22 = arith.addf %19, %21 : vector<8x64xf32>
    %23 = arith.truncf %22 : vector<8x64xf32> to vector<8x64xbf16>
    %24 = vector.extract_strided_slice %23 {offsets = [0, 0], sizes = [8, 8], strides = [1, 1]} : vector<8x64xbf16> to vector<8x8xbf16>
    %25 = vector.extract_strided_slice %23 {offsets = [0, 8], sizes = [8, 8], strides = [1, 1]} : vector<8x64xbf16> to vector<8x8xbf16>
    %26 = vector.extract_strided_slice %23 {offsets = [0, 16], sizes = [8, 8], strides = [1, 1]} : vector<8x64xbf16> to vector<8x8xbf16>
    %27 = vector.extract_strided_slice %23 {offsets = [0, 24], sizes = [8, 8], strides = [1, 1]} : vector<8x64xbf16> to vector<8x8xbf16>
    %28 = vector.shape_cast %24 : vector<8x8xbf16> to vector<1x8x8xbf16>
    %29 = vector.shape_cast %25 : vector<8x8xbf16> to vector<1x8x8xbf16>
    %30 = vector.shape_cast %26 : vector<8x8xbf16> to vector<1x8x8xbf16>
    %31 = vector.shape_cast %27 : vector<8x8xbf16> to vector<1x8x8xbf16>
    %32 = tpu.concatenate %28, %29, %30, %31 in 0 : vector<1x8x8xbf16>, vector<1x8x8xbf16>, vector<1x8x8xbf16>, vector<1x8x8xbf16> -> vector<4x8x8xbf16>
    %33 = vector.extract_strided_slice %23 {offsets = [0, 32], sizes = [8, 8], strides = [1, 1]} : vector<8x64xbf16> to vector<8x8xbf16>
    %34 = vector.extract_strided_slice %23 {offsets = [0, 40], sizes = [8, 8], strides = [1, 1]} : vector<8x64xbf16> to vector<8x8xbf16>
    %35 = vector.extract_strided_slice %23 {offsets = [0, 48], sizes = [8, 8], strides = [1, 1]} : vector<8x64xbf16> to vector<8x8xbf16>
    %36 = vector.extract_strided_slice %23 {offsets = [0, 56], sizes = [8, 8], strides = [1, 1]} : vector<8x64xbf16> to vector<8x8xbf16>
    %37 = vector.shape_cast %33 : vector<8x8xbf16> to vector<1x8x8xbf16>
    %38 = vector.shape_cast %34 : vector<8x8xbf16> to vector<1x8x8xbf16>
    %39 = vector.shape_cast %35 : vector<8x8xbf16> to vector<1x8x8xbf16>
    %40 = vector.shape_cast %36 : vector<8x8xbf16> to vector<1x8x8xbf16>
    %41 = tpu.concatenate %37, %38, %39, %40 in 0 : vector<1x8x8xbf16>, vector<1x8x8xbf16>, vector<1x8x8xbf16>, vector<1x8x8xbf16> -> vector<4x8x8xbf16>
    %42 = arith.truncf %1 : vector<8x32xf32> to vector<8x32xbf16>
    %c0_18 = arith.constant 0 : index
    %c0_19 = arith.constant 0 : index
    %43 = vector.load %arg4[%c0_18, %c0_19] : memref<32x96xbf16, #tpu.memory_space<vmem>>, vector<32x96xbf16>
    %cst_20 = arith.constant dense<0.000000e+00> : vector<8x96xf32>
    %44 = tpu.matmul %42, %43, %cst_20 {dimension_numbers = #tpu.dot_dimension_numbers<[1], [0], [0], [1], [0, 0, 1, 1], [], []>} : vector<8x32xbf16>, vector<32x96xbf16>, vector<8x96xf32> -> vector<8x96xf32>
    %c0_21 = arith.constant 0 : index
    %c0_22 = arith.constant 0 : index
    %45 = vector.load %arg5[%c0_21, %c0_22] : memref<1x96xf32, #tpu.memory_space<vmem>>, vector<1x96xf32>
    %46 = vector.broadcast %45 : vector<1x96xf32> to vector<8x96xf32>
    %47 = arith.addf %44, %46 : vector<8x96xf32>
    %48 = arith.truncf %47 : vector<8x96xf32> to vector<8x96xbf16>
    %49 = vector.extract_strided_slice %48 {offsets = [0, 0], sizes = [8, 8], strides = [1, 1]} : vector<8x96xbf16> to vector<8x8xbf16>
    %50 = vector.extract_strided_slice %48 {offsets = [0, 8], sizes = [8, 8], strides = [1, 1]} : vector<8x96xbf16> to vector<8x8xbf16>
    %51 = vector.extract_strided_slice %48 {offsets = [0, 16], sizes = [8, 8], strides = [1, 1]} : vector<8x96xbf16> to vector<8x8xbf16>
    %52 = vector.extract_strided_slice %48 {offsets = [0, 24], sizes = [8, 8], strides = [1, 1]} : vector<8x96xbf16> to vector<8x8xbf16>
    %53 = vector.shape_cast %49 : vector<8x8xbf16> to vector<1x8x8xbf16>
    %54 = vector.shape_cast %50 : vector<8x8xbf16> to vector<1x8x8xbf16>
    %55 = vector.shape_cast %51 : vector<8x8xbf16> to vector<1x8x8xbf16>
    %56 = vector.shape_cast %52 : vector<8x8xbf16> to vector<1x8x8xbf16>
    %57 = tpu.concatenate %53, %54, %55, %56 in 0 : vector<1x8x8xbf16>, vector<1x8x8xbf16>, vector<1x8x8xbf16>, vector<1x8x8xbf16> -> vector<4x8x8xbf16>
    %58 = vector.extract_strided_slice %48 {offsets = [0, 32], sizes = [8, 8], strides = [1, 1]} : vector<8x96xbf16> to vector<8x8xbf16>
    %59 = vector.extract_strided_slice %48 {offsets = [0, 40], sizes = [8, 8], strides = [1, 1]} : vector<8x96xbf16> to vector<8x8xbf16>
    %60 = vector.extract_strided_slice %48 {offsets = [0, 48], sizes = [8, 8], strides = [1, 1]} : vector<8x96xbf16> to vector<8x8xbf16>
    %61 = vector.extract_strided_slice %48 {offsets = [0, 56], sizes = [8, 8], strides = [1, 1]} : vector<8x96xbf16> to vector<8x8xbf16>
    %62 = vector.shape_cast %58 : vector<8x8xbf16> to vector<1x8x8xbf16>
    %63 = vector.shape_cast %59 : vector<8x8xbf16> to vector<1x8x8xbf16>
    %64 = vector.shape_cast %60 : vector<8x8xbf16> to vector<1x8x8xbf16>
    %65 = vector.shape_cast %61 : vector<8x8xbf16> to vector<1x8x8xbf16>
    %66 = tpu.concatenate %62, %63, %64, %65 in 0 : vector<1x8x8xbf16>, vector<1x8x8xbf16>, vector<1x8x8xbf16>, vector<1x8x8xbf16> -> vector<4x8x8xbf16>
    %67 = vector.extract_strided_slice %48 {offsets = [0, 64], sizes = [8, 8], strides = [1, 1]} : vector<8x96xbf16> to vector<8x8xbf16>
    %68 = vector.extract_strided_slice %48 {offsets = [0, 72], sizes = [8, 8], strides = [1, 1]} : vector<8x96xbf16> to vector<8x8xbf16>
    %69 = vector.extract_strided_slice %48 {offsets = [0, 80], sizes = [8, 8], strides = [1, 1]} : vector<8x96xbf16> to vector<8x8xbf16>
    %70 = vector.extract_strided_slice %48 {offsets = [0, 88], sizes = [8, 8], strides = [1, 1]} : vector<8x96xbf16> to vector<8x8xbf16>
    %71 = vector.shape_cast %67 : vector<8x8xbf16> to vector<1x8x8xbf16>
    %72 = vector.shape_cast %68 : vector<8x8xbf16> to vector<1x8x8xbf16>
    %73 = vector.shape_cast %69 : vector<8x8xbf16> to vector<1x8x8xbf16>
    %74 = vector.shape_cast %70 : vector<8x8xbf16> to vector<1x8x8xbf16>
    %75 = tpu.concatenate %71, %72, %73, %74 in 0 : vector<1x8x8xbf16>, vector<1x8x8xbf16>, vector<1x8x8xbf16>, vector<1x8x8xbf16> -> vector<4x8x8xbf16>
    "tpu.trace_start"() <{level = 10 : i32, message = "hqd,hkd->hqk"}> : () -> ()
    %cst_23 = arith.constant dense<0.000000e+00> : vector<4x8x8xf32>
    %76 = tpu.matmul %57, %66, %cst_23 {dimension_numbers = #tpu.dot_dimension_numbers<[2], [2], [1], [1], [0, 0, 0, 1, 1, 1], [0], [0]>} : vector<4x8x8xbf16>, vector<4x8x8xbf16>, vector<4x8x8xf32> -> vector<4x8x8xf32>
    "tpu.trace_stop"() : () -> ()
    %cst_24 = arith.constant 0.353553385 : f32
    %77 = vector.broadcast %cst_24 : f32 to vector<4x8x8xf32>
    %78 = arith.mulf %76, %77 : vector<4x8x8xf32>
    %79 = vector.broadcast %6 : vector<1x1x8xf32> to vector<4x8x8xf32>
    %80 = arith.addf %78, %79 : vector<4x8x8xf32>
    %cst_25 = arith.constant dense<0xFF800000> : vector<4x8xf32>
    %81 = vector.multi_reduction <maximumf>, %80, %cst_25 [2] : vector<4x8x8xf32> to vector<4x8xf32>
    %82 = vector.shape_cast %81 : vector<4x8xf32> to vector<4x8x1xf32>
    %83 = vector.broadcast %82 : vector<4x8x1xf32> to vector<4x8x8xf32>
    %84 = arith.subf %80, %83 : vector<4x8x8xf32>
    %85 = math.exp %84 : vector<4x8x8xf32>
    %cst_26 = arith.constant dense<0.000000e+00> : vector<4x8xf32>
    %86 = vector.multi_reduction <add>, %85, %cst_26 [2] : vector<4x8x8xf32> to vector<4x8xf32>
    %87 = vector.shape_cast %86 : vector<4x8xf32> to vector<4x8x1xf32>
    %88 = tpu.reciprocal %87 {approx = true} : vector<4x8x1xf32> -> vector<4x8x1xf32>
    %89 = vector.broadcast %88 : vector<4x8x1xf32> to vector<4x8x8xf32>
    %90 = arith.mulf %85, %89 : vector<4x8x8xf32>
    %91 = arith.truncf %90 : vector<4x8x8xf32> to vector<4x8x8xbf16>
    "tpu.trace_start"() <{level = 10 : i32, message = "hqk,hkd->hqd"}> : () -> ()
    %cst_27 = arith.constant dense<0.000000e+00> : vector<4x8x8xf32>
    %92 = tpu.matmul %91, %75, %cst_27 {dimension_numbers = #tpu.dot_dimension_numbers<[2], [1], [1], [2], [0, 0, 0, 1, 1, 2], [0], [0]>} : vector<4x8x8xbf16>, vector<4x8x8xbf16>, vector<4x8x8xf32> -> vector<4x8x8xf32>
    "tpu.trace_stop"() : () -> ()
    %93 = vector.extract_strided_slice %92 {offsets = [0, 0, 0], sizes = [1, 8, 8], strides = [1, 1, 1]} : vector<4x8x8xf32> to vector<1x8x8xf32>
    %94 = vector.shape_cast %93 : vector<1x8x8xf32> to vector<8x8xf32>
    %95 = vector.extract_strided_slice %92 {offsets = [1, 0, 0], sizes = [1, 8, 8], strides = [1, 1, 1]} : vector<4x8x8xf32> to vector<1x8x8xf32>
    %96 = vector.shape_cast %95 : vector<1x8x8xf32> to vector<8x8xf32>
    %97 = vector.extract_strided_slice %92 {offsets = [2, 0, 0], sizes = [1, 8, 8], strides = [1, 1, 1]} : vector<4x8x8xf32> to vector<1x8x8xf32>
    %98 = vector.shape_cast %97 : vector<1x8x8xf32> to vector<8x8xf32>
    %99 = vector.extract_strided_slice %92 {offsets = [3, 0, 0], sizes = [1, 8, 8], strides = [1, 1, 1]} : vector<4x8x8xf32> to vector<1x8x8xf32>
    %100 = vector.shape_cast %99 : vector<1x8x8xf32> to vector<8x8xf32>
    %101 = tpu.concatenate %94, %96, %98, %100 in 1 : vector<8x8xf32>, vector<8x8xf32>, vector<8x8xf32>, vector<8x8xf32> -> vector<8x32xf32>
    %102 = arith.truncf %101 : vector<8x32xf32> to vector<8x32xbf16>
    %c0_28 = arith.constant 0 : index
    %c0_29 = arith.constant 0 : index
    %103 = vector.load %arg6[%c0_28, %c0_29] : memref<32x32xbf16, #tpu.memory_space<vmem>>, vector<32x32xbf16>
    %cst_30 = arith.constant dense<0.000000e+00> : vector<8x32xf32>
    %104 = tpu.matmul %102, %103, %cst_30 {dimension_numbers = #tpu.dot_dimension_numbers<[1], [0], [0], [1], [0, 0, 1, 1], [], []>} : vector<8x32xbf16>, vector<32x32xbf16>, vector<8x32xf32> -> vector<8x32xf32>
    %c0_31 = arith.constant 0 : index
    %c0_32 = arith.constant 0 : index
    %105 = vector.load %arg7[%c0_31, %c0_32] : memref<1x32xf32, #tpu.memory_space<vmem>>, vector<1x32xf32>
    %106 = vector.broadcast %105 : vector<1x32xf32> to vector<8x32xf32>
    %107 = arith.addf %104, %106 : vector<8x32xf32>
    %108 = arith.addf %1, %107 : vector<8x32xf32>
    %cst_33 = arith.constant dense<0.000000e+00> : vector<8xf32>
    %109 = vector.multi_reduction <add>, %108, %cst_33 [1] : vector<8x32xf32> to vector<8xf32>
    %110 = vector.shape_cast %109 : vector<8xf32> to vector<8x1xf32>
    %cst_34 = arith.constant 3.200000e+01 : f32
    %111 = vector.broadcast %cst_34 : f32 to vector<8x1xf32>
    %112 = arith.divf %110, %111 : vector<8x1xf32>
    %113 = vector.broadcast %112 : vector<8x1xf32> to vector<8x32xf32>
    %114 = arith.subf %108, %113 : vector<8x32xf32>
    %115 = vector.broadcast %112 : vector<8x1xf32> to vector<8x32xf32>
    %116 = arith.subf %108, %115 : vector<8x32xf32>
    %117 = arith.mulf %114, %116 : vector<8x32xf32>
    %cst_35 = arith.constant dense<0.000000e+00> : vector<8xf32>
    %118 = vector.multi_reduction <add>, %117, %cst_35 [1] : vector<8x32xf32> to vector<8xf32>
    %119 = vector.shape_cast %118 : vector<8xf32> to vector<8x1xf32>
    %cst_36 = arith.constant 3.200000e+01 : f32
    %120 = vector.broadcast %cst_36 : f32 to vector<8x1xf32>
    %121 = arith.divf %119, %120 : vector<8x1xf32>
    %122 = vector.broadcast %112 : vector<8x1xf32> to vector<8x32xf32>
    %123 = arith.subf %108, %122 : vector<8x32xf32>
    %cst_37 = arith.constant 9.99999974E-6 : f32
    %124 = vector.broadcast %cst_37 : f32 to vector<8x1xf32>
    %125 = arith.addf %121, %124 : vector<8x1xf32>
    %126 = math.rsqrt %125 : vector<8x1xf32>
    %127 = vector.broadcast %126 : vector<8x1xf32> to vector<8x32xf32>
    %128 = arith.mulf %123, %127 : vector<8x32xf32>
    %129 = vector.broadcast %9 : vector<1x32xf32> to vector<8x32xf32>
    %130 = arith.mulf %128, %129 : vector<8x32xf32>
    %131 = vector.broadcast %12 : vector<1x32xf32> to vector<8x32xf32>
    %132 = arith.addf %130, %131 : vector<8x32xf32>
    %133 = arith.truncf %132 : vector<8x32xf32> to vector<8x32xbf16>
    %c0_38 = arith.constant 0 : index
    %c0_39 = arith.constant 0 : index
    %134 = vector.load %arg8[%c0_38, %c0_39] : memref<32x32xbf16, #tpu.memory_space<vmem>>, vector<32x32xbf16>
    %cst_40 = arith.constant dense<0.000000e+00> : vector<8x32xf32>
    %135 = tpu.matmul %133, %134, %cst_40 {dimension_numbers = #tpu.dot_dimension_numbers<[1], [0], [0], [1], [0, 0, 1, 1], [], []>} : vector<8x32xbf16>, vector<32x32xbf16>, vector<8x32xf32> -> vector<8x32xf32>
    %c0_41 = arith.constant 0 : index
    %c0_42 = arith.constant 0 : index
    %136 = vector.load %arg9[%c0_41, %c0_42] : memref<1x32xf32, #tpu.memory_space<vmem>>, vector<1x32xf32>
    %137 = vector.broadcast %136 : vector<1x32xf32> to vector<8x32xf32>
    %138 = arith.addf %135, %137 : vector<8x32xf32>
    %139 = arith.truncf %138 : vector<8x32xf32> to vector<8x32xbf16>
    %140 = vector.extract_strided_slice %139 {offsets = [0, 0], sizes = [8, 8], strides = [1, 1]} : vector<8x32xbf16> to vector<8x8xbf16>
    %141 = vector.extract_strided_slice %139 {offsets = [0, 8], sizes = [8, 8], strides = [1, 1]} : vector<8x32xbf16> to vector<8x8xbf16>
    %142 = vector.extract_strided_slice %139 {offsets = [0, 16], sizes = [8, 8], strides = [1, 1]} : vector<8x32xbf16> to vector<8x8xbf16>
    %143 = vector.extract_strided_slice %139 {offsets = [0, 24], sizes = [8, 8], strides = [1, 1]} : vector<8x32xbf16> to vector<8x8xbf16>
    %144 = vector.shape_cast %140 : vector<8x8xbf16> to vector<1x8x8xbf16>
    %145 = vector.shape_cast %141 : vector<8x8xbf16> to vector<1x8x8xbf16>
    %146 = vector.shape_cast %142 : vector<8x8xbf16> to vector<1x8x8xbf16>
    %147 = vector.shape_cast %143 : vector<8x8xbf16> to vector<1x8x8xbf16>
    %148 = tpu.concatenate %144, %145, %146, %147 in 0 : vector<1x8x8xbf16>, vector<1x8x8xbf16>, vector<1x8x8xbf16>, vector<1x8x8xbf16> -> vector<4x8x8xbf16>
    "tpu.trace_start"() <{level = 10 : i32, message = "hqd,hkd->hqk"}> : () -> ()
    %cst_43 = arith.constant dense<0.000000e+00> : vector<4x8x8xf32>
    %149 = tpu.matmul %148, %32, %cst_43 {dimension_numbers = #tpu.dot_dimension_numbers<[2], [2], [1], [1], [0, 0, 0, 1, 1, 1], [0], [0]>} : vector<4x8x8xbf16>, vector<4x8x8xbf16>, vector<4x8x8xf32> -> vector<4x8x8xf32>
    "tpu.trace_stop"() : () -> ()
    %cst_44 = arith.constant 0.353553385 : f32
    %150 = vector.broadcast %cst_44 : f32 to vector<4x8x8xf32>
    %151 = arith.mulf %149, %150 : vector<4x8x8xf32>
    %152 = vector.broadcast %6 : vector<1x1x8xf32> to vector<4x8x8xf32>
    %153 = arith.addf %151, %152 : vector<4x8x8xf32>
    %cst_45 = arith.constant dense<0xFF800000> : vector<4x8xf32>
    %154 = vector.multi_reduction <maximumf>, %153, %cst_45 [2] : vector<4x8x8xf32> to vector<4x8xf32>
    %155 = vector.shape_cast %154 : vector<4x8xf32> to vector<4x8x1xf32>
    %156 = vector.broadcast %155 : vector<4x8x1xf32> to vector<4x8x8xf32>
    %157 = arith.subf %153, %156 : vector<4x8x8xf32>
    %158 = math.exp %157 : vector<4x8x8xf32>
    %cst_46 = arith.constant dense<0.000000e+00> : vector<4x8xf32>
    %159 = vector.multi_reduction <add>, %158, %cst_46 [2] : vector<4x8x8xf32> to vector<4x8xf32>
    %160 = vector.shape_cast %159 : vector<4x8xf32> to vector<4x8x1xf32>
    %161 = tpu.reciprocal %160 {approx = true} : vector<4x8x1xf32> -> vector<4x8x1xf32>
    %162 = vector.broadcast %161 : vector<4x8x1xf32> to vector<4x8x8xf32>
    %163 = arith.mulf %158, %162 : vector<4x8x8xf32>
    %164 = arith.truncf %163 : vector<4x8x8xf32> to vector<4x8x8xbf16>
    "tpu.trace_start"() <{level = 10 : i32, message = "hqk,hkd->hqd"}> : () -> ()
    %cst_47 = arith.constant dense<0.000000e+00> : vector<4x8x8xf32>
    %165 = tpu.matmul %164, %41, %cst_47 {dimension_numbers = #tpu.dot_dimension_numbers<[2], [1], [1], [2], [0, 0, 0, 1, 1, 2], [0], [0]>} : vector<4x8x8xbf16>, vector<4x8x8xbf16>, vector<4x8x8xf32> -> vector<4x8x8xf32>
    "tpu.trace_stop"() : () -> ()
    %166 = vector.extract_strided_slice %165 {offsets = [0, 0, 0], sizes = [1, 8, 8], strides = [1, 1, 1]} : vector<4x8x8xf32> to vector<1x8x8xf32>
    %167 = vector.shape_cast %166 : vector<1x8x8xf32> to vector<8x8xf32>
    %168 = vector.extract_strided_slice %165 {offsets = [1, 0, 0], sizes = [1, 8, 8], strides = [1, 1, 1]} : vector<4x8x8xf32> to vector<1x8x8xf32>
    %169 = vector.shape_cast %168 : vector<1x8x8xf32> to vector<8x8xf32>
    %170 = vector.extract_strided_slice %165 {offsets = [2, 0, 0], sizes = [1, 8, 8], strides = [1, 1, 1]} : vector<4x8x8xf32> to vector<1x8x8xf32>
    %171 = vector.shape_cast %170 : vector<1x8x8xf32> to vector<8x8xf32>
    %172 = vector.extract_strided_slice %165 {offsets = [3, 0, 0], sizes = [1, 8, 8], strides = [1, 1, 1]} : vector<4x8x8xf32> to vector<1x8x8xf32>
    %173 = vector.shape_cast %172 : vector<1x8x8xf32> to vector<8x8xf32>
    %174 = tpu.concatenate %167, %169, %171, %173 in 1 : vector<8x8xf32>, vector<8x8xf32>, vector<8x8xf32>, vector<8x8xf32> -> vector<8x32xf32>
    %175 = arith.truncf %174 : vector<8x32xf32> to vector<8x32xbf16>
    %c0_48 = arith.constant 0 : index
    %c0_49 = arith.constant 0 : index
    %176 = vector.load %arg12[%c0_48, %c0_49] : memref<32x32xbf16, #tpu.memory_space<vmem>>, vector<32x32xbf16>
    %cst_50 = arith.constant dense<0.000000e+00> : vector<8x32xf32>
    %177 = tpu.matmul %175, %176, %cst_50 {dimension_numbers = #tpu.dot_dimension_numbers<[1], [0], [0], [1], [0, 0, 1, 1], [], []>} : vector<8x32xbf16>, vector<32x32xbf16>, vector<8x32xf32> -> vector<8x32xf32>
    %c0_51 = arith.constant 0 : index
    %c0_52 = arith.constant 0 : index
    %178 = vector.load %arg13[%c0_51, %c0_52] : memref<1x32xf32, #tpu.memory_space<vmem>>, vector<1x32xf32>
    %179 = vector.broadcast %178 : vector<1x32xf32> to vector<8x32xf32>
    %180 = arith.addf %177, %179 : vector<8x32xf32>
    %181 = arith.addf %132, %180 : vector<8x32xf32>
    %cst_53 = arith.constant dense<0.000000e+00> : vector<8xf32>
    %182 = vector.multi_reduction <add>, %181, %cst_53 [1] : vector<8x32xf32> to vector<8xf32>
    %183 = vector.shape_cast %182 : vector<8xf32> to vector<8x1xf32>
    %cst_54 = arith.constant 3.200000e+01 : f32
    %184 = vector.broadcast %cst_54 : f32 to vector<8x1xf32>
    %185 = arith.divf %183, %184 : vector<8x1xf32>
    %186 = vector.broadcast %185 : vector<8x1xf32> to vector<8x32xf32>
    %187 = arith.subf %181, %186 : vector<8x32xf32>
    %188 = vector.broadcast %185 : vector<8x1xf32> to vector<8x32xf32>
    %189 = arith.subf %181, %188 : vector<8x32xf32>
    %190 = arith.mulf %187, %189 : vector<8x32xf32>
    %cst_55 = arith.constant dense<0.000000e+00> : vector<8xf32>
    %191 = vector.multi_reduction <add>, %190, %cst_55 [1] : vector<8x32xf32> to vector<8xf32>
    %192 = vector.shape_cast %191 : vector<8xf32> to vector<8x1xf32>
    %cst_56 = arith.constant 3.200000e+01 : f32
    %193 = vector.broadcast %cst_56 : f32 to vector<8x1xf32>
    %194 = arith.divf %192, %193 : vector<8x1xf32>
    %195 = vector.broadcast %185 : vector<8x1xf32> to vector<8x32xf32>
    %196 = arith.subf %181, %195 : vector<8x32xf32>
    %cst_57 = arith.constant 9.99999974E-6 : f32
    %197 = vector.broadcast %cst_57 : f32 to vector<8x1xf32>
    %198 = arith.addf %194, %197 : vector<8x1xf32>
    %199 = math.rsqrt %198 : vector<8x1xf32>
    %200 = vector.broadcast %199 : vector<8x1xf32> to vector<8x32xf32>
    %201 = arith.mulf %196, %200 : vector<8x32xf32>
    %202 = vector.broadcast %10 : vector<1x32xf32> to vector<8x32xf32>
    %203 = arith.mulf %201, %202 : vector<8x32xf32>
    %204 = vector.broadcast %13 : vector<1x32xf32> to vector<8x32xf32>
    %205 = arith.addf %203, %204 : vector<8x32xf32>
    %206 = arith.truncf %205 : vector<8x32xf32> to vector<8x32xbf16>
    %c0_58 = arith.constant 0 : index
    %c0_59 = arith.constant 0 : index
    %207 = vector.load %arg14[%c0_58, %c0_59] : memref<32x64xbf16, #tpu.memory_space<vmem>>, vector<32x64xbf16>
    %cst_60 = arith.constant dense<0.000000e+00> : vector<8x64xf32>
    %208 = tpu.matmul %206, %207, %cst_60 {dimension_numbers = #tpu.dot_dimension_numbers<[1], [0], [0], [1], [0, 0, 1, 1], [], []>} : vector<8x32xbf16>, vector<32x64xbf16>, vector<8x64xf32> -> vector<8x64xf32>
    %c0_61 = arith.constant 0 : index
    %c0_62 = arith.constant 0 : index
    %209 = vector.load %arg15[%c0_61, %c0_62] : memref<1x64xf32, #tpu.memory_space<vmem>>, vector<1x64xf32>
    %210 = vector.broadcast %209 : vector<1x64xf32> to vector<8x64xf32>
    %211 = arith.addf %208, %210 : vector<8x64xf32>
    %cst_63 = arith.constant 0.000000e+00 : f32
    %212 = vector.broadcast %cst_63 : f32 to vector<8x64xf32>
    %213 = arith.maximumf %211, %212 : vector<8x64xf32>
    %214 = arith.truncf %213 : vector<8x64xf32> to vector<8x64xbf16>
    %c0_64 = arith.constant 0 : index
    %c0_65 = arith.constant 0 : index
    %215 = vector.load %arg16[%c0_64, %c0_65] : memref<64x32xbf16, #tpu.memory_space<vmem>>, vector<64x32xbf16>
    %cst_66 = arith.constant dense<0.000000e+00> : vector<8x32xf32>
    %216 = tpu.matmul %214, %215, %cst_66 {dimension_numbers = #tpu.dot_dimension_numbers<[1], [0], [0], [1], [0, 0, 1, 1], [], []>} : vector<8x64xbf16>, vector<64x32xbf16>, vector<8x32xf32> -> vector<8x32xf32>
    %c0_67 = arith.constant 0 : index
    %c0_68 = arith.constant 0 : index
    %217 = vector.load %arg17[%c0_67, %c0_68] : memref<1x32xf32, #tpu.memory_space<vmem>>, vector<1x32xf32>
    %218 = vector.broadcast %217 : vector<1x32xf32> to vector<8x32xf32>
    %219 = arith.addf %216, %218 : vector<8x32xf32>
    %220 = arith.addf %205, %219 : vector<8x32xf32>
    %cst_69 = arith.constant dense<0.000000e+00> : vector<8xf32>
    %221 = vector.multi_reduction <add>, %220, %cst_69 [1] : vector<8x32xf32> to vector<8xf32>
    %222 = vector.shape_cast %221 : vector<8xf32> to vector<8x1xf32>
    %cst_70 = arith.constant 3.200000e+01 : f32
    %223 = vector.broadcast %cst_70 : f32 to vector<8x1xf32>
    %224 = arith.divf %222, %223 : vector<8x1xf32>
    %225 = vector.broadcast %224 : vector<8x1xf32> to vector<8x32xf32>
    %226 = arith.subf %220, %225 : vector<8x32xf32>
    %227 = vector.broadcast %224 : vector<8x1xf32> to vector<8x32xf32>
    %228 = arith.subf %220, %227 : vector<8x32xf32>
    %229 = arith.mulf %226, %228 : vector<8x32xf32>
    %cst_71 = arith.constant dense<0.000000e+00> : vector<8xf32>
    %230 = vector.multi_reduction <add>, %229, %cst_71 [1] : vector<8x32xf32> to vector<8xf32>
    %231 = vector.shape_cast %230 : vector<8xf32> to vector<8x1xf32>
    %cst_72 = arith.constant 3.200000e+01 : f32
    %232 = vector.broadcast %cst_72 : f32 to vector<8x1xf32>
    %233 = arith.divf %231, %232 : vector<8x1xf32>
    %234 = vector.broadcast %224 : vector<8x1xf32> to vector<8x32xf32>
    %235 = arith.subf %220, %234 : vector<8x32xf32>
    %cst_73 = arith.constant 9.99999974E-6 : f32
    %236 = vector.broadcast %cst_73 : f32 to vector<8x1xf32>
    %237 = arith.addf %233, %236 : vector<8x1xf32>
    %238 = math.rsqrt %237 : vector<8x1xf32>
    %239 = vector.broadcast %238 : vector<8x1xf32> to vector<8x32xf32>
    %240 = arith.mulf %235, %239 : vector<8x32xf32>
    %241 = vector.broadcast %11 : vector<1x32xf32> to vector<8x32xf32>
    %242 = arith.mulf %240, %241 : vector<8x32xf32>
    %243 = vector.broadcast %14 : vector<1x32xf32> to vector<8x32xf32>
    %244 = arith.addf %242, %243 : vector<8x32xf32>
    %245 = arith.truncf %244 : vector<8x32xf32> to vector<8x32xbf16>
    %c0_74 = arith.constant 0 : index
    %c0_75 = arith.constant 0 : index
    %246 = vector.load %arg4[%c0_74, %c0_75] : memref<32x96xbf16, #tpu.memory_space<vmem>>, vector<32x96xbf16>
    %cst_76 = arith.constant dense<0.000000e+00> : vector<8x96xf32>
    %247 = tpu.matmul %245, %246, %cst_76 {dimension_numbers = #tpu.dot_dimension_numbers<[1], [0], [0], [1], [0, 0, 1, 1], [], []>} : vector<8x32xbf16>, vector<32x96xbf16>, vector<8x96xf32> -> vector<8x96xf32>
    %c0_77 = arith.constant 0 : index
    %c0_78 = arith.constant 0 : index
    %248 = vector.load %arg5[%c0_77, %c0_78] : memref<1x96xf32, #tpu.memory_space<vmem>>, vector<1x96xf32>
    %249 = vector.broadcast %248 : vector<1x96xf32> to vector<8x96xf32>
    %250 = arith.addf %247, %249 : vector<8x96xf32>
    %251 = arith.truncf %250 : vector<8x96xf32> to vector<8x96xbf16>
    %252 = vector.extract_strided_slice %251 {offsets = [0, 0], sizes = [8, 8], strides = [1, 1]} : vector<8x96xbf16> to vector<8x8xbf16>
    %253 = vector.extract_strided_slice %251 {offsets = [0, 8], sizes = [8, 8], strides = [1, 1]} : vector<8x96xbf16> to vector<8x8xbf16>
    %254 = vector.extract_strided_slice %251 {offsets = [0, 16], sizes = [8, 8], strides = [1, 1]} : vector<8x96xbf16> to vector<8x8xbf16>
    %255 = vector.extract_strided_slice %251 {offsets = [0, 24], sizes = [8, 8], strides = [1, 1]} : vector<8x96xbf16> to vector<8x8xbf16>
    %256 = vector.shape_cast %252 : vector<8x8xbf16> to vector<1x8x8xbf16>
    %257 = vector.shape_cast %253 : vector<8x8xbf16> to vector<1x8x8xbf16>
    %258 = vector.shape_cast %254 : vector<8x8xbf16> to vector<1x8x8xbf16>
    %259 = vector.shape_cast %255 : vector<8x8xbf16> to vector<1x8x8xbf16>
    %260 = tpu.concatenate %256, %257, %258, %259 in 0 : vector<1x8x8xbf16>, vector<1x8x8xbf16>, vector<1x8x8xbf16>, vector<1x8x8xbf16> -> vector<4x8x8xbf16>
    %261 = vector.extract_strided_slice %251 {offsets = [0, 32], sizes = [8, 8], strides = [1, 1]} : vector<8x96xbf16> to vector<8x8xbf16>
    %262 = vector.extract_strided_slice %251 {offsets = [0, 40], sizes = [8, 8], strides = [1, 1]} : vector<8x96xbf16> to vector<8x8xbf16>
    %263 = vector.extract_strided_slice %251 {offsets = [0, 48], sizes = [8, 8], strides = [1, 1]} : vector<8x96xbf16> to vector<8x8xbf16>
    %264 = vector.extract_strided_slice %251 {offsets = [0, 56], sizes = [8, 8], strides = [1, 1]} : vector<8x96xbf16> to vector<8x8xbf16>
    %265 = vector.shape_cast %261 : vector<8x8xbf16> to vector<1x8x8xbf16>
    %266 = vector.shape_cast %262 : vector<8x8xbf16> to vector<1x8x8xbf16>
    %267 = vector.shape_cast %263 : vector<8x8xbf16> to vector<1x8x8xbf16>
    %268 = vector.shape_cast %264 : vector<8x8xbf16> to vector<1x8x8xbf16>
    %269 = tpu.concatenate %265, %266, %267, %268 in 0 : vector<1x8x8xbf16>, vector<1x8x8xbf16>, vector<1x8x8xbf16>, vector<1x8x8xbf16> -> vector<4x8x8xbf16>
    %270 = vector.extract_strided_slice %251 {offsets = [0, 64], sizes = [8, 8], strides = [1, 1]} : vector<8x96xbf16> to vector<8x8xbf16>
    %271 = vector.extract_strided_slice %251 {offsets = [0, 72], sizes = [8, 8], strides = [1, 1]} : vector<8x96xbf16> to vector<8x8xbf16>
    %272 = vector.extract_strided_slice %251 {offsets = [0, 80], sizes = [8, 8], strides = [1, 1]} : vector<8x96xbf16> to vector<8x8xbf16>
    %273 = vector.extract_strided_slice %251 {offsets = [0, 88], sizes = [8, 8], strides = [1, 1]} : vector<8x96xbf16> to vector<8x8xbf16>
    %274 = vector.shape_cast %270 : vector<8x8xbf16> to vector<1x8x8xbf16>
    %275 = vector.shape_cast %271 : vector<8x8xbf16> to vector<1x8x8xbf16>
    %276 = vector.shape_cast %272 : vector<8x8xbf16> to vector<1x8x8xbf16>
    %277 = vector.shape_cast %273 : vector<8x8xbf16> to vector<1x8x8xbf16>
    %278 = tpu.concatenate %274, %275, %276, %277 in 0 : vector<1x8x8xbf16>, vector<1x8x8xbf16>, vector<1x8x8xbf16>, vector<1x8x8xbf16> -> vector<4x8x8xbf16>
    "tpu.trace_start"() <{level = 10 : i32, message = "hqd,hkd->hqk"}> : () -> ()
    %cst_79 = arith.constant dense<0.000000e+00> : vector<4x8x8xf32>
    %279 = tpu.matmul %260, %269, %cst_79 {dimension_numbers = #tpu.dot_dimension_numbers<[2], [2], [1], [1], [0, 0, 0, 1, 1, 1], [0], [0]>} : vector<4x8x8xbf16>, vector<4x8x8xbf16>, vector<4x8x8xf32> -> vector<4x8x8xf32>
    "tpu.trace_stop"() : () -> ()
    %cst_80 = arith.constant 0.353553385 : f32
    %280 = vector.broadcast %cst_80 : f32 to vector<4x8x8xf32>
    %281 = arith.mulf %279, %280 : vector<4x8x8xf32>
    %282 = vector.broadcast %6 : vector<1x1x8xf32> to vector<4x8x8xf32>
    %283 = arith.addf %281, %282 : vector<4x8x8xf32>
    %cst_81 = arith.constant dense<0xFF800000> : vector<4x8xf32>
    %284 = vector.multi_reduction <maximumf>, %283, %cst_81 [2] : vector<4x8x8xf32> to vector<4x8xf32>
    %285 = vector.shape_cast %284 : vector<4x8xf32> to vector<4x8x1xf32>
    %286 = vector.broadcast %285 : vector<4x8x1xf32> to vector<4x8x8xf32>
    %287 = arith.subf %283, %286 : vector<4x8x8xf32>
    %288 = math.exp %287 : vector<4x8x8xf32>
    %cst_82 = arith.constant dense<0.000000e+00> : vector<4x8xf32>
    %289 = vector.multi_reduction <add>, %288, %cst_82 [2] : vector<4x8x8xf32> to vector<4x8xf32>
    %290 = vector.shape_cast %289 : vector<4x8xf32> to vector<4x8x1xf32>
    %291 = tpu.reciprocal %290 {approx = true} : vector<4x8x1xf32> -> vector<4x8x1xf32>
    %292 = vector.broadcast %291 : vector<4x8x1xf32> to vector<4x8x8xf32>
    %293 = arith.mulf %288, %292 : vector<4x8x8xf32>
    %294 = arith.truncf %293 : vector<4x8x8xf32> to vector<4x8x8xbf16>
    "tpu.trace_start"() <{level = 10 : i32, message = "hqk,hkd->hqd"}> : () -> ()
    %cst_83 = arith.constant dense<0.000000e+00> : vector<4x8x8xf32>
    %295 = tpu.matmul %294, %278, %cst_83 {dimension_numbers = #tpu.dot_dimension_numbers<[2], [1], [1], [2], [0, 0, 0, 1, 1, 2], [0], [0]>} : vector<4x8x8xbf16>, vector<4x8x8xbf16>, vector<4x8x8xf32> -> vector<4x8x8xf32>
    "tpu.trace_stop"() : () -> ()
    %296 = vector.extract_strided_slice %295 {offsets = [0, 0, 0], sizes = [1, 8, 8], strides = [1, 1, 1]} : vector<4x8x8xf32> to vector<1x8x8xf32>
    %297 = vector.shape_cast %296 : vector<1x8x8xf32> to vector<8x8xf32>
    %298 = vector.extract_strided_slice %295 {offsets = [1, 0, 0], sizes = [1, 8, 8], strides = [1, 1, 1]} : vector<4x8x8xf32> to vector<1x8x8xf32>
    %299 = vector.shape_cast %298 : vector<1x8x8xf32> to vector<8x8xf32>
    %300 = vector.extract_strided_slice %295 {offsets = [2, 0, 0], sizes = [1, 8, 8], strides = [1, 1, 1]} : vector<4x8x8xf32> to vector<1x8x8xf32>
    %301 = vector.shape_cast %300 : vector<1x8x8xf32> to vector<8x8xf32>
    %302 = vector.extract_strided_slice %295 {offsets = [3, 0, 0], sizes = [1, 8, 8], strides = [1, 1, 1]} : vector<4x8x8xf32> to vector<1x8x8xf32>
    %303 = vector.shape_cast %302 : vector<1x8x8xf32> to vector<8x8xf32>
    %304 = tpu.concatenate %297, %299, %301, %303 in 1 : vector<8x8xf32>, vector<8x8xf32>, vector<8x8xf32>, vector<8x8xf32> -> vector<8x32xf32>
    %305 = arith.truncf %304 : vector<8x32xf32> to vector<8x32xbf16>
    %c0_84 = arith.constant 0 : index
    %c0_85 = arith.constant 0 : index
    %306 = vector.load %arg6[%c0_84, %c0_85] : memref<32x32xbf16, #tpu.memory_space<vmem>>, vector<32x32xbf16>
    %cst_86 = arith.constant dense<0.000000e+00> : vector<8x32xf32>
    %307 = tpu.matmul %305, %306, %cst_86 {dimension_numbers = #tpu.dot_dimension_numbers<[1], [0], [0], [1], [0, 0, 1, 1], [], []>} : vector<8x32xbf16>, vector<32x32xbf16>, vector<8x32xf32> -> vector<8x32xf32>
    %c0_87 = arith.constant 0 : index
    %c0_88 = arith.constant 0 : index
    %308 = vector.load %arg7[%c0_87, %c0_88] : memref<1x32xf32, #tpu.memory_space<vmem>>, vector<1x32xf32>
    %309 = vector.broadcast %308 : vector<1x32xf32> to vector<8x32xf32>
    %310 = arith.addf %307, %309 : vector<8x32xf32>
    %311 = arith.addf %244, %310 : vector<8x32xf32>
    %cst_89 = arith.constant dense<0.000000e+00> : vector<8xf32>
    %312 = vector.multi_reduction <add>, %311, %cst_89 [1] : vector<8x32xf32> to vector<8xf32>
    %313 = vector.shape_cast %312 : vector<8xf32> to vector<8x1xf32>
    %cst_90 = arith.constant 3.200000e+01 : f32
    %314 = vector.broadcast %cst_90 : f32 to vector<8x1xf32>
    %315 = arith.divf %313, %314 : vector<8x1xf32>
    %316 = vector.broadcast %315 : vector<8x1xf32> to vector<8x32xf32>
    %317 = arith.subf %311, %316 : vector<8x32xf32>
    %318 = vector.broadcast %315 : vector<8x1xf32> to vector<8x32xf32>
    %319 = arith.subf %311, %318 : vector<8x32xf32>
    %320 = arith.mulf %317, %319 : vector<8x32xf32>
    %cst_91 = arith.constant dense<0.000000e+00> : vector<8xf32>
    %321 = vector.multi_reduction <add>, %320, %cst_91 [1] : vector<8x32xf32> to vector<8xf32>
    %322 = vector.shape_cast %321 : vector<8xf32> to vector<8x1xf32>
    %cst_92 = arith.constant 3.200000e+01 : f32
    %323 = vector.broadcast %cst_92 : f32 to vector<8x1xf32>
    %324 = arith.divf %322, %323 : vector<8x1xf32>
    %325 = vector.broadcast %315 : vector<8x1xf32> to vector<8x32xf32>
    %326 = arith.subf %311, %325 : vector<8x32xf32>
    %cst_93 = arith.constant 9.99999974E-6 : f32
    %327 = vector.broadcast %cst_93 : f32 to vector<8x1xf32>
    %328 = arith.addf %324, %327 : vector<8x1xf32>
    %329 = math.rsqrt %328 : vector<8x1xf32>
    %330 = vector.broadcast %329 : vector<8x1xf32> to vector<8x32xf32>
    %331 = arith.mulf %326, %330 : vector<8x32xf32>
    %332 = vector.broadcast %9 : vector<1x32xf32> to vector<8x32xf32>
    %333 = arith.mulf %331, %332 : vector<8x32xf32>
    %334 = vector.broadcast %12 : vector<1x32xf32> to vector<8x32xf32>
    %335 = arith.addf %333, %334 : vector<8x32xf32>
    %336 = arith.truncf %335 : vector<8x32xf32> to vector<8x32xbf16>
    %c0_94 = arith.constant 0 : index
    %c0_95 = arith.constant 0 : index
    %337 = vector.load %arg8[%c0_94, %c0_95] : memref<32x32xbf16, #tpu.memory_space<vmem>>, vector<32x32xbf16>
    %cst_96 = arith.constant dense<0.000000e+00> : vector<8x32xf32>
    %338 = tpu.matmul %336, %337, %cst_96 {dimension_numbers = #tpu.dot_dimension_numbers<[1], [0], [0], [1], [0, 0, 1, 1], [], []>} : vector<8x32xbf16>, vector<32x32xbf16>, vector<8x32xf32> -> vector<8x32xf32>
    %c0_97 = arith.constant 0 : index
    %c0_98 = arith.constant 0 : index
    %339 = vector.load %arg9[%c0_97, %c0_98] : memref<1x32xf32, #tpu.memory_space<vmem>>, vector<1x32xf32>
    %340 = vector.broadcast %339 : vector<1x32xf32> to vector<8x32xf32>
    %341 = arith.addf %338, %340 : vector<8x32xf32>
    %342 = arith.truncf %341 : vector<8x32xf32> to vector<8x32xbf16>
    %343 = vector.extract_strided_slice %342 {offsets = [0, 0], sizes = [8, 8], strides = [1, 1]} : vector<8x32xbf16> to vector<8x8xbf16>
    %344 = vector.extract_strided_slice %342 {offsets = [0, 8], sizes = [8, 8], strides = [1, 1]} : vector<8x32xbf16> to vector<8x8xbf16>
    %345 = vector.extract_strided_slice %342 {offsets = [0, 16], sizes = [8, 8], strides = [1, 1]} : vector<8x32xbf16> to vector<8x8xbf16>
    %346 = vector.extract_strided_slice %342 {offsets = [0, 24], sizes = [8, 8], strides = [1, 1]} : vector<8x32xbf16> to vector<8x8xbf16>
    %347 = vector.shape_cast %343 : vector<8x8xbf16> to vector<1x8x8xbf16>
    %348 = vector.shape_cast %344 : vector<8x8xbf16> to vector<1x8x8xbf16>
    %349 = vector.shape_cast %345 : vector<8x8xbf16> to vector<1x8x8xbf16>
    %350 = vector.shape_cast %346 : vector<8x8xbf16> to vector<1x8x8xbf16>
    %351 = tpu.concatenate %347, %348, %349, %350 in 0 : vector<1x8x8xbf16>, vector<1x8x8xbf16>, vector<1x8x8xbf16>, vector<1x8x8xbf16> -> vector<4x8x8xbf16>
    "tpu.trace_start"() <{level = 10 : i32, message = "hqd,hkd->hqk"}> : () -> ()
    %cst_99 = arith.constant dense<0.000000e+00> : vector<4x8x8xf32>
    %352 = tpu.matmul %351, %32, %cst_99 {dimension_numbers = #tpu.dot_dimension_numbers<[2], [2], [1], [1], [0, 0, 0, 1, 1, 1], [0], [0]>} : vector<4x8x8xbf16>, vector<4x8x8xbf16>, vector<4x8x8xf32> -> vector<4x8x8xf32>
    "tpu.trace_stop"() : () -> ()
    %cst_100 = arith.constant 0.353553385 : f32
    %353 = vector.broadcast %cst_100 : f32 to vector<4x8x8xf32>
    %354 = arith.mulf %352, %353 : vector<4x8x8xf32>
    %355 = vector.broadcast %6 : vector<1x1x8xf32> to vector<4x8x8xf32>
    %356 = arith.addf %354, %355 : vector<4x8x8xf32>
    %cst_101 = arith.constant dense<0xFF800000> : vector<4x8xf32>
    %357 = vector.multi_reduction <maximumf>, %356, %cst_101 [2] : vector<4x8x8xf32> to vector<4x8xf32>
    %358 = vector.shape_cast %357 : vector<4x8xf32> to vector<4x8x1xf32>
    %359 = vector.broadcast %358 : vector<4x8x1xf32> to vector<4x8x8xf32>
    %360 = arith.subf %356, %359 : vector<4x8x8xf32>
    %361 = math.exp %360 : vector<4x8x8xf32>
    %cst_102 = arith.constant dense<0.000000e+00> : vector<4x8xf32>
    %362 = vector.multi_reduction <add>, %361, %cst_102 [2] : vector<4x8x8xf32> to vector<4x8xf32>
    %363 = vector.shape_cast %362 : vector<4x8xf32> to vector<4x8x1xf32>
    %364 = tpu.reciprocal %363 {approx = true} : vector<4x8x1xf32> -> vector<4x8x1xf32>
    %365 = vector.broadcast %364 : vector<4x8x1xf32> to vector<4x8x8xf32>
    %366 = arith.mulf %361, %365 : vector<4x8x8xf32>
    %367 = arith.truncf %366 : vector<4x8x8xf32> to vector<4x8x8xbf16>
    "tpu.trace_start"() <{level = 10 : i32, message = "hqk,hkd->hqd"}> : () -> ()
    %cst_103 = arith.constant dense<0.000000e+00> : vector<4x8x8xf32>
    %368 = tpu.matmul %367, %41, %cst_103 {dimension_numbers = #tpu.dot_dimension_numbers<[2], [1], [1], [2], [0, 0, 0, 1, 1, 2], [0], [0]>} : vector<4x8x8xbf16>, vector<4x8x8xbf16>, vector<4x8x8xf32> -> vector<4x8x8xf32>
    "tpu.trace_stop"() : () -> ()
    %369 = vector.extract_strided_slice %368 {offsets = [0, 0, 0], sizes = [1, 8, 8], strides = [1, 1, 1]} : vector<4x8x8xf32> to vector<1x8x8xf32>
    %370 = vector.shape_cast %369 : vector<1x8x8xf32> to vector<8x8xf32>
    %371 = vector.extract_strided_slice %368 {offsets = [1, 0, 0], sizes = [1, 8, 8], strides = [1, 1, 1]} : vector<4x8x8xf32> to vector<1x8x8xf32>
    %372 = vector.shape_cast %371 : vector<1x8x8xf32> to vector<8x8xf32>
    %373 = vector.extract_strided_slice %368 {offsets = [2, 0, 0], sizes = [1, 8, 8], strides = [1, 1, 1]} : vector<4x8x8xf32> to vector<1x8x8xf32>
    %374 = vector.shape_cast %373 : vector<1x8x8xf32> to vector<8x8xf32>
    %375 = vector.extract_strided_slice %368 {offsets = [3, 0, 0], sizes = [1, 8, 8], strides = [1, 1, 1]} : vector<4x8x8xf32> to vector<1x8x8xf32>
    %376 = vector.shape_cast %375 : vector<1x8x8xf32> to vector<8x8xf32>
    %377 = tpu.concatenate %370, %372, %374, %376 in 1 : vector<8x8xf32>, vector<8x8xf32>, vector<8x8xf32>, vector<8x8xf32> -> vector<8x32xf32>
    %378 = arith.truncf %377 : vector<8x32xf32> to vector<8x32xbf16>
    %c0_104 = arith.constant 0 : index
    %c0_105 = arith.constant 0 : index
    %379 = vector.load %arg12[%c0_104, %c0_105] : memref<32x32xbf16, #tpu.memory_space<vmem>>, vector<32x32xbf16>
    %cst_106 = arith.constant dense<0.000000e+00> : vector<8x32xf32>
    %380 = tpu.matmul %378, %379, %cst_106 {dimension_numbers = #tpu.dot_dimension_numbers<[1], [0], [0], [1], [0, 0, 1, 1], [], []>} : vector<8x32xbf16>, vector<32x32xbf16>, vector<8x32xf32> -> vector<8x32xf32>
    %c0_107 = arith.constant 0 : index
    %c0_108 = arith.constant 0 : index
    %381 = vector.load %arg13[%c0_107, %c0_108] : memref<1x32xf32, #tpu.memory_space<vmem>>, vector<1x32xf32>
    %382 = vector.broadcast %381 : vector<1x32xf32> to vector<8x32xf32>
    %383 = arith.addf %380, %382 : vector<8x32xf32>
    %384 = arith.addf %335, %383 : vector<8x32xf32>
    %cst_109 = arith.constant dense<0.000000e+00> : vector<8xf32>
    %385 = vector.multi_reduction <add>, %384, %cst_109 [1] : vector<8x32xf32> to vector<8xf32>
    %386 = vector.shape_cast %385 : vector<8xf32> to vector<8x1xf32>
    %cst_110 = arith.constant 3.200000e+01 : f32
    %387 = vector.broadcast %cst_110 : f32 to vector<8x1xf32>
    %388 = arith.divf %386, %387 : vector<8x1xf32>
    %389 = vector.broadcast %388 : vector<8x1xf32> to vector<8x32xf32>
    %390 = arith.subf %384, %389 : vector<8x32xf32>
    %391 = vector.broadcast %388 : vector<8x1xf32> to vector<8x32xf32>
    %392 = arith.subf %384, %391 : vector<8x32xf32>
    %393 = arith.mulf %390, %392 : vector<8x32xf32>
    %cst_111 = arith.constant dense<0.000000e+00> : vector<8xf32>
    %394 = vector.multi_reduction <add>, %393, %cst_111 [1] : vector<8x32xf32> to vector<8xf32>
    %395 = vector.shape_cast %394 : vector<8xf32> to vector<8x1xf32>
    %cst_112 = arith.constant 3.200000e+01 : f32
    %396 = vector.broadcast %cst_112 : f32 to vector<8x1xf32>
    %397 = arith.divf %395, %396 : vector<8x1xf32>
    %398 = vector.broadcast %388 : vector<8x1xf32> to vector<8x32xf32>
    %399 = arith.subf %384, %398 : vector<8x32xf32>
    %cst_113 = arith.constant 9.99999974E-6 : f32
    %400 = vector.broadcast %cst_113 : f32 to vector<8x1xf32>
    %401 = arith.addf %397, %400 : vector<8x1xf32>
    %402 = math.rsqrt %401 : vector<8x1xf32>
    %403 = vector.broadcast %402 : vector<8x1xf32> to vector<8x32xf32>
    %404 = arith.mulf %399, %403 : vector<8x32xf32>
    %405 = vector.broadcast %10 : vector<1x32xf32> to vector<8x32xf32>
    %406 = arith.mulf %404, %405 : vector<8x32xf32>
    %407 = vector.broadcast %13 : vector<1x32xf32> to vector<8x32xf32>
    %408 = arith.addf %406, %407 : vector<8x32xf32>
    %409 = arith.truncf %408 : vector<8x32xf32> to vector<8x32xbf16>
    %c0_114 = arith.constant 0 : index
    %c0_115 = arith.constant 0 : index
    %410 = vector.load %arg14[%c0_114, %c0_115] : memref<32x64xbf16, #tpu.memory_space<vmem>>, vector<32x64xbf16>
    %cst_116 = arith.constant dense<0.000000e+00> : vector<8x64xf32>
    %411 = tpu.matmul %409, %410, %cst_116 {dimension_numbers = #tpu.dot_dimension_numbers<[1], [0], [0], [1], [0, 0, 1, 1], [], []>} : vector<8x32xbf16>, vector<32x64xbf16>, vector<8x64xf32> -> vector<8x64xf32>
    %c0_117 = arith.constant 0 : index
    %c0_118 = arith.constant 0 : index
    %412 = vector.load %arg15[%c0_117, %c0_118] : memref<1x64xf32, #tpu.memory_space<vmem>>, vector<1x64xf32>
    %413 = vector.broadcast %412 : vector<1x64xf32> to vector<8x64xf32>
    %414 = arith.addf %411, %413 : vector<8x64xf32>
    %cst_119 = arith.constant 0.000000e+00 : f32
    %415 = vector.broadcast %cst_119 : f32 to vector<8x64xf32>
    %416 = arith.maximumf %414, %415 : vector<8x64xf32>
    %417 = arith.truncf %416 : vector<8x64xf32> to vector<8x64xbf16>
    %c0_120 = arith.constant 0 : index
    %c0_121 = arith.constant 0 : index
    %418 = vector.load %arg16[%c0_120, %c0_121] : memref<64x32xbf16, #tpu.memory_space<vmem>>, vector<64x32xbf16>
    %cst_122 = arith.constant dense<0.000000e+00> : vector<8x32xf32>
    %419 = tpu.matmul %417, %418, %cst_122 {dimension_numbers = #tpu.dot_dimension_numbers<[1], [0], [0], [1], [0, 0, 1, 1], [], []>} : vector<8x64xbf16>, vector<64x32xbf16>, vector<8x32xf32> -> vector<8x32xf32>
    %c0_123 = arith.constant 0 : index
    %c0_124 = arith.constant 0 : index
    %420 = vector.load %arg17[%c0_123, %c0_124] : memref<1x32xf32, #tpu.memory_space<vmem>>, vector<1x32xf32>
    %421 = vector.broadcast %420 : vector<1x32xf32> to vector<8x32xf32>
    %422 = arith.addf %419, %421 : vector<8x32xf32>
    %423 = arith.addf %408, %422 : vector<8x32xf32>
    %cst_125 = arith.constant dense<0.000000e+00> : vector<8xf32>
    %424 = vector.multi_reduction <add>, %423, %cst_125 [1] : vector<8x32xf32> to vector<8xf32>
    %425 = vector.shape_cast %424 : vector<8xf32> to vector<8x1xf32>
    %cst_126 = arith.constant 3.200000e+01 : f32
    %426 = vector.broadcast %cst_126 : f32 to vector<8x1xf32>
    %427 = arith.divf %425, %426 : vector<8x1xf32>
    %428 = vector.broadcast %427 : vector<8x1xf32> to vector<8x32xf32>
    %429 = arith.subf %423, %428 : vector<8x32xf32>
    %430 = vector.broadcast %427 : vector<8x1xf32> to vector<8x32xf32>
    %431 = arith.subf %423, %430 : vector<8x32xf32>
    %432 = arith.mulf %429, %431 : vector<8x32xf32>
    %cst_127 = arith.constant dense<0.000000e+00> : vector<8xf32>
    %433 = vector.multi_reduction <add>, %432, %cst_127 [1] : vector<8x32xf32> to vector<8xf32>
    %434 = vector.shape_cast %433 : vector<8xf32> to vector<8x1xf32>
    %cst_128 = arith.constant 3.200000e+01 : f32
    %435 = vector.broadcast %cst_128 : f32 to vector<8x1xf32>
    %436 = arith.divf %434, %435 : vector<8x1xf32>
    %437 = vector.broadcast %427 : vector<8x1xf32> to vector<8x32xf32>
    %438 = arith.subf %423, %437 : vector<8x32xf32>
    %cst_129 = arith.constant 9.99999974E-6 : f32
    %439 = vector.broadcast %cst_129 : f32 to vector<8x1xf32>
    %440 = arith.addf %436, %439 : vector<8x1xf32>
    %441 = math.rsqrt %440 : vector<8x1xf32>
    %442 = vector.broadcast %441 : vector<8x1xf32> to vector<8x32xf32>
    %443 = arith.mulf %438, %442 : vector<8x32xf32>
    %444 = vector.broadcast %11 : vector<1x32xf32> to vector<8x32xf32>
    %445 = arith.mulf %443, %444 : vector<8x32xf32>
    %446 = vector.broadcast %14 : vector<1x32xf32> to vector<8x32xf32>
    %447 = arith.addf %445, %446 : vector<8x32xf32>
    %448 = vector.shape_cast %447 : vector<8x32xf32> to vector<1x8x32xf32>
    %c0_130 = arith.constant 0 : index
    %c0_131 = arith.constant 0 : index
    %c0_132 = arith.constant 0 : index
    %449 = vector.load %arg20[%c0_130, %c0_131, %c0_132] : memref<1x8x32xf32, #tpu.memory_space<vmem>>, vector<1x8x32xf32>
    tpu.vector_store %arg20[%c0_130, %c0_131, %c0_132], %448 {strides = array<i32>} : memref<1x8x32xf32, #tpu.memory_space<vmem>>, vector<1x8x32xf32>,
    return
  }
  func.func @transform_0(%arg0: i32) -> (i32, i32, i32) {
    %c0_i32 = arith.constant 0 : i32
    %c0_i32_0 = arith.constant 0 : i32
    %c0_i32_1 = arith.constant 0 : i32
    return %arg0, %c0_i32, %c0_i32_0 : i32, i32, i32
  }
  func.func @transform_1(%arg0: i32) -> (i32, i32, i32) {
    %c0_i32 = arith.constant 0 : i32
    %c0_i32_0 = arith.constant 0 : i32
    %c0_i32_1 = arith.constant 0 : i32
    return %arg0, %c0_i32, %c0_i32_0 : i32, i32, i32
  }
  func.func @transform_2(%arg0: i32) -> (i32, i32, i32) {
    %c0_i32 = arith.constant 0 : i32
    %c0_i32_0 = arith.constant 0 : i32
    %c0_i32_1 = arith.constant 0 : i32
    return %arg0, %c0_i32, %c0_i32_0 : i32, i32, i32
  }
  func.func @transform_3(%arg0: i32) -> (i32, i32) {
    %c0_i32 = arith.constant 0 : i32
    %c0_i32_0 = arith.constant 0 : i32
    %c0_i32_1 = arith.constant 0 : i32
    return %c0_i32, %c0_i32_0 : i32, i32
  }
  func.func @transform_4(%arg0: i32) -> (i32, i32) {
    %c0_i32 = arith.constant 0 : i32
    %c0_i32_0 = arith.constant 0 : i32
    %c0_i32_1 = arith.constant 0 : i32
    return %c0_i32, %c0_i32_0 : i32, i32
  }
  func.func @transform_5(%arg0: i32) -> (i32, i32) {
    %c0_i32 = arith.constant 0 : i32
    %c0_i32_0 = arith.constant 0 : i32
    %c0_i32_1 = arith.constant 0 : i32
    return %c0_i32, %c0_i32_0 : i32, i32
  }
  func.func @transform_6(%arg0: i32) -> (i32, i32) {
    %c0_i32 = arith.constant 0 : i32
    %c0_i32_0 = arith.constant 0 : i32
    %c0_i32_1 = arith.constant 0 : i32
    return %c0_i32, %c0_i32_0 : i32, i32
  }
  func.func @transform_7(%arg0: i32) -> (i32, i32) {
    %c0_i32 = arith.constant 0 : i32
    %c0_i32_0 = arith.constant 0 : i32
    %c0_i32_1 = arith.constant 0 : i32
    return %c0_i32, %c0_i32_0 : i32, i32
  }
  func.func @transform_8(%arg0: i32) -> (i32, i32) {
    %c0_i32 = arith.constant 0 : i32
    %c0_i32_0 = arith.constant 0 : i32
    %c0_i32_1 = arith.constant 0 : i32
    return %c0_i32, %c0_i32_0 : i32, i32
  }
  func.func @transform_9(%arg0: i32) -> (i32, i32) {
    %c0_i32 = arith.constant 0 : i32
    %c0_i32_0 = arith.constant 0 : i32
    %c0_i32_1 = arith.constant 0 : i32
    return %c0_i32, %c0_i32_0 : i32, i32
  }
  func.func @transform_10(%arg0: i32) -> (i32, i32) {
    %c0_i32 = arith.constant 0 : i32
    %c0_i32_0 = arith.constant 0 : i32
    %c0_i32_1 = arith.constant 0 : i32
    return %c0_i32, %c0_i32_0 : i32, i32
  }
  func.func @transform_11(%arg0: i32) -> (i32, i32) {
    %c0_i32 = arith.constant 0 : i32
    %c0_i32_0 = arith.constant 0 : i32
    %c0_i32_1 = arith.constant 0 : i32
    return %c0_i32, %c0_i32_0 : i32, i32
  }
  func.func @transform_12(%arg0: i32) -> (i32, i32) {
    %c0_i32 = arith.constant 0 : i32
    %c0_i32_0 = arith.constant 0 : i32
    %c0_i32_1 = arith.constant 0 : i32
    return %c0_i32, %c0_i32_0 : i32, i32
  }
  func.func @transform_13(%arg0: i32) -> (i32, i32) {
    %c0_i32 = arith.constant 0 : i32
    %c0_i32_0 = arith.constant 0 : i32
    %c0_i32_1 = arith.constant 0 : i32
    return %c0_i32, %c0_i32_0 : i32, i32
  }
  func.func @transform_14(%arg0: i32) -> (i32, i32) {
    %c0_i32 = arith.constant 0 : i32
    %c0_i32_0 = arith.constant 0 : i32
    %c0_i32_1 = arith.constant 0 : i32
    return %c0_i32, %c0_i32_0 : i32, i32
  }
  func.func @transform_15(%arg0: i32) -> (i32, i32) {
    %c0_i32 = arith.constant 0 : i32
    %c0_i32_0 = arith.constant 0 : i32
    %c0_i32_1 = arith.constant 0 : i32
    return %c0_i32, %c0_i32_0 : i32, i32
  }
  func.func @transform_16(%arg0: i32) -> (i32, i32) {
    %c0_i32 = arith.constant 0 : i32
    %c0_i32_0 = arith.constant 0 : i32
    %c0_i32_1 = arith.constant 0 : i32
    return %c0_i32, %c0_i32_0 : i32, i32
  }
  func.func @transform_17(%arg0: i32) -> (i32, i32) {
    %c0_i32 = arith.constant 0 : i32
    %c0_i32_0 = arith.constant 0 : i32
    %c0_i32_1 = arith.constant 0 : i32
    return %c0_i32, %c0_i32_0 : i32, i32
  }
  func.func @transform_18(%arg0: i32) -> (i32, i32) {
    %c0_i32 = arith.constant 0 : i32
    %c0_i32_0 = arith.constant 0 : i32
    %c0_i32_1 = arith.constant 0 : i32
    return %c0_i32, %c0_i32_0 : i32, i32
  }
  func.func @transform_19(%arg0: i32) -> (i32, i32, i32) {
    %c0_i32 = arith.constant 0 : i32
    %c0_i32_0 = arith.constant 0 : i32
    %c0_i32_1 = arith.constant 0 : i32
    return %arg0, %c0_i32, %c0_i32_0 : i32, i32, i32
  }
}

</mosaic_0001>

<bundles_post_ra>
// kernel: encoder_forward.1
= control target key start
LH: loop header
LB: loop body
LE: loop exit
PB: predicated region body
PF: predicated region fallthrough
CT: control target
= control target key end

     0   :  { %s5180_s0 = inlined_call_operand.vmem [shape: f32[2,8,32], index: 0, kind: input, shape index: {}]   ;;  %s5181_s1 = inlined_call_operand.vmem [shape: f32[2,8,32], index: 1, kind: input, shape index: {}]   ;;  %s5182_s2 = inlined_call_operand.vmem [shape: f32[2,1,8], index: 2, kind: input, shape index: {}]   ;;  %s5183_s3 = inlined_call_operand.vmem [shape: bf16[32,96], index: 3, kind: input, shape index: {}]   ;;  %s5184_s4 = inlined_call_operand.vmem [shape: f32[1,96], index: 4, kind: input, shape index: {}]   ;;  %s5185_s5 = inlined_call_operand.vmem [shape: bf16[32,32], index: 5, kind: input, shape index: {}]   ;;  %s5186_s6 = inlined_call_operand.vmem [shape: f32[1,32], index: 6, kind: input, shape index: {}]   ;;  %s5187_s7 = inlined_call_operand.vmem [shape: bf16[32,32], index: 7, kind: input, shape index: {}]   ;;  %s5188_s8 = inlined_call_operand.vmem [shape: f32[1,32], index: 8, kind: input, shape index: {}]   ;;  %s5189_s9 = inlined_call_operand.vmem [shape: bf16[32,64], index: 9, kind: input, shape index: {}]   ;;  %s5190_s10 = inlined_call_operand.vmem [shape: f32[1,64], index: 10, kind: input, shape index: {}]   ;;  %s5191_s11 = inlined_call_operand.vmem [shape: bf16[32,32], index: 11, kind: input, shape index: {}]   ;;  %s5192_s12 = inlined_call_operand.vmem [shape: f32[1,32], index: 12, kind: input, shape index: {}]   ;;  %s5193_s13 = inlined_call_operand.vmem [shape: bf16[32,64], index: 13, kind: input, shape index: {}]   ;;  %s5194_s14 = inlined_call_operand.vmem [shape: f32[1,64], index: 14, kind: input, shape index: {}]   ;;  %s5195_s15 = inlined_call_operand.vmem [shape: bf16[64,32], index: 15, kind: input, shape index: {}]   ;;  %s5196_s16 = inlined_call_operand.vmem [shape: f32[1,32], index: 16, kind: input, shape index: {}]   ;;  %s5197_s17 = inlined_call_operand.vmem [shape: f32[3,32], index: 17, kind: input, shape index: {}]   ;;  %s5198_s18 = inlined_call_operand.vmem [shape: f32[3,32], index: 18, kind: input, shape index: {}]   ;;  %s5199_s19 = inlined_call_operand.hbm [shape: f32[2,8,32], index: 19, kind: output, shape index: {}]  }
   0x1   :  { %5222 = sst [smem:[#allocation10_spill]] %s5180_s0 }
   0x2   :  { %5223 = sst [smem:[#allocation11_spill]] %s5181_s1 }
   0x3   :  { %5224 = sst [smem:[#allocation12_spill]] %s5182_s2 }
   0x4   :  { %5225 = sst [smem:[#allocation13_spill]] %s5183_s3 }
   0x5   :  { %5226 = sst [smem:[#allocation14_spill]] %s5186_s6 }
   0x6   :  { %24 = vsyncpa [#allocation3], 0 }
   0x7   :  { %26 = vsyncpa [#allocation3 + $0x1], 0  ;;  %s4423_s0 = smov 0   ;;  %s4425_s30 = smov 0  }
   0x8   :  { %s4427_s20 = smov 0   ;;  %s4429_s21 = smov 0  }
   0x9 LB: > { %5227 = sst [smem:[#allocation5_spill]] %s4298_s0  ;;  %s4444_s1 = sadd.s32 4294967295, %s4310_s21   ;;  %s4310_s21 = sphi %s4429_s21, %s5249_s21   ;;  %s4306_s20 = sphi %s4427_s20, %s5251_s20   ;;  %s4302_s30 = sphi %s4425_s30, %s5253_s30   ;;  %s4298_s0 = sphi %s4423_s0, %s5252_s0  }
   0xa   : > { %5228 = sst [smem:[#allocation6_spill]] %s4306_s20  ;;  %s3582_s22 = sadd.s32 4294967294, %s4310_s21  }
   0xb   : > { %s4448_s2 = sadd.s32 1, %s4310_s21   ;;  %s453_s23 = sadd.s32 1, %s4306_s20 }
   0xc   : > { %5229 = sst [smem:[#allocation7_spill]] %s4448_s2  ;;  %s450_s24 = ssub.s32 %s4310_s21, %s4448_s2 }
   0xd   : > { %p463_p0 = scmp.ne.s32.totalorder %s4306_s20, %s4302_s30  ;;  %p451_p1 = scmp.eq.s32.totalorder %s450_s24, 0 }
   0xe   : > { %p464_p2 = scmp.eq.s32.totalorder %s4444_s1, 1  ;;  %p469_p3 = scmp.ne.s32.totalorder %s4302_s30, %s4298_s0 }
   0xf   : > { %p470_p4 = scmp.eq.s32.totalorder %s3582_s22, 1  ;;  %p3585_p7 = scmp.ge.s32.totalorder %s4310_s21, 1 }
  0x10   : > { %s4459_s25 = scalar_select %p451_p1, %s4306_s20, %s453_s23  }
  0x11   : > { %p4461_p5 = por %p464_p2, %p463_p0  ;;  %p4465_p6 = por %p470_p4, %p469_p3 }
  0x12   : > { %5230 = sst [smem:[#allocation8_spill]] %s4459_s25  ;;  %p556_p8 = scmp.lt.s32.totalorder %s4310_s21, 3 }
  0x13   : > { %s5232_s26 = scalar_select %p4465_p6, 1, 0 }
  0x14   : > { %p557_p9 = pnand %p3585_p7, %p556_p8 }
  0x15   : > { %5233 = sst [smem:[#allocation9_spill]] %s5232_s26  ;;  %s5234_s29 = sld [smem:[#allocation13_spill]] (!%p557_p9)  ;;  %v4312_v1 = vmov (!%p557_p9), 0.0   ;;  %vm4313_vm0 = vmmov (!%p557_p9), 0   ;;  %vm661_vm1 = vcmask (!%p557_p9), 261120   ;;  %v4144_v5 = vld [vmem:[%s5189_s9] sm:$0xff] (!%p557_p9)   ;;  %v986_v31 = vlaneseq (!%p557_p9) }
  0x16   : > { %560 = sbr.rel (%p557_p9) target bundleno = 8722 (0x2212), region = 96  ;;  %3797 = vmatprep.subr.bf16.mxu1 (!%p557_p9), %v4312_v1  ;;  %3789 = vmatprep.subr.bf16.mxu0 (!%p557_p9), %v4312_v1  ;;  %p618_p10 = scmp.lt.s32.totalorder (!%p557_p9), %s4444_s1, 1  ;;  %v4145_v6 = vld [vmem:[%s5189_s9 + $0x8] sm:$0xff] (!%p557_p9)   ;;  %v3594_v9 = vld [vmem:[%s5184_s4] ss:$0 sm:$0xff] (!%p557_p9)  ;;  %vm790_vm2 = vcmask (!%p557_p9), 64512  }
  0x17   : > { %3801 = vmatprep.mubr.msk.bf16.mxu1 (!%p557_p9), %vm4313_vm0, %v4312_v1  ;;  %3793 = vmatprep.mubr.msk.bf16.mxu0 (!%p557_p9), %vm4313_vm0, %v4312_v1  ;;  %s5235_s20 = sld [smem:[#allocation10_spill]] (!%p557_p9)  ;;  %s5236_s26 = sld [smem:[#allocation11_spill]] (!%p557_p9)  ;;  %v4569_v34 = vshrl.u32 (!%p557_p9), %v986_v31, 7  ;;  %vm1048_vm3 = vcmask (!%p557_p9), 1043456   ;;  %vm1249_vm4 = vcmask (!%p557_p9), 130048   ;;  %vm1251_vm5 = vcmask (!%p557_p9), 195584  }
  0x18   : > { %3790 = vmatpush3.bf16.msra.mxu0 (!%p557_p9), %v4144_v5  ;;  %s5216_s25 = smov (!%p557_p9), 104   ;;  %s5212_s23 = smov (!%p557_p9), 16   ;;  %vm2066_vm6 = vcmask (!%p557_p9), 523264  }
  0x19   : > { %3791 = vmatprep.subr.bf16.mxu0 (!%p557_p9), %v4312_v1  ;;  %v4572_v36 = vsub.s32 (!%p557_p9), 0, %v4569_v34  ;;  %s5238_s6 = sld [smem:[#allocation14_spill]] (!%p557_p9)  ;;  %s5243_s28 = smov (!%p557_p9), 120  }
  0x1b   : > { %v4142_v0 = vld [vmem:[%s5234_s29] sm:$0xff] (!%p557_p9)   ;;  %v4143_v2 = vld [vmem:[%s5234_s29 + $0x8] sm:$0xff] (!%p557_p9)  }
  0x1c   : > { %3798 = vmatpush3.bf16.msra.mxu1 (!%p557_p9), %v4142_v0  ;;  %3792 = vmatpush3.bf16.msra.mxu0 (!%p557_p9), %v4145_v6 }
  0x1d   : > { %3799 = vmatprep.subr.bf16.mxu1 %v4312_v1  ;;  %s4486_s24 = scalar_select %p618_p10, %s4444_s1, 1  ;;  %3805 = vmatprep.subr.bf16.mxu0 %v4312_v1 }
  0x1f   : > { %s3587_s27 = sshll.u32 %s4486_s24, 3 }
  0x20   : > { %3800 = vmatpush3.bf16.msra.mxu1 %v4143_v2  ;;  %s621_s22 = scalar_lea.vmem %s5235_s20, %s3587_s27  ;;  %s625_s0 = scalar_lea.vmem %s5236_s26, %s3587_s27 }
  0x21   : > { %3811 = vmatprep.subr.bf16.mxu1 %v4312_v1  ;;  %v4493_v3 = vld [vmem:[%s621_s22] sm:$0xff]  ;;  %s5214_s26 = smov 96   ;;  %s5220_s27 = smov 112  }
  0x22   : > { %v713_v4 = vpack.c.bf16 %v4493_v3, %v4493_v3  ;;  %v636_v7 = vld [vmem:[%s625_s0] sm:$0xff]  ;;  %s5218_s0 = smov 120   ;;  %s5237_s22 = sld [smem:[#allocation12_spill]] }
  0x23   : > { %v637_v8 = vpack.c.bf16 %v636_v7, %v636_v7  ;;  %s5208_s20 = smov 24  }
  0x24   : > { %3802 = vmatmul.mubr.msk.bf16.vlgmr.msra.gmra.mrb[0].mxu1 %vm661_vm1, %v713_v4 }
  0x25   : > { %3813 = vmatprep.mubr.msk.bf16.mxu1 %vm4313_vm0, %v4312_v1  ;;  %3794 = vmatmul.mubr.msk.bf16.vlgmr.msra.gmra.mrb[0].mxu0 %vm661_vm1, %v637_v8 }
  0x26   : > { %3807 = vmatprep.mubr.msk.bf16.mxu0 %vm4313_vm0, %v4312_v1 }
  0x28   : > { %s628_s2 = scalar_lea.vmem %s5237_s22, %s4486_s24  ;;  %s5206_s24 = smov 64  }
  0x29   : > { %v631_v32 = vld [vmem:[%s628_s2] sm:$0x1]  ;;  %s5210_s2 = smov 8  }
  0x2a   : > { %v3589_v33 = vadd.f32 -1.0, %v631_v32 }
  0x2c   : > { %v633_v35 = vmul.f32 1e+09, %v3589_v33 }
  0x2e   : > { %v4575_v37 = vrot.slane %v633_v35, %v4572_v36 }
  0xf7   : > { %v774_v10 = vpop.f32.mrb[0].mxu1 }
  0xf8   : > { %v775_v11 = vadd.f32 %v3594_v9, %v774_v10  ;;  %v3803_v12 = vpop.f32.mrb[1].mxu1  ;;  %v4545_v21 = vpop.f32.mrb[0].mxu0 }
  0xf9   : > { %v777_v13 = vpop.f32.mrb[2].mxu1  ;;  %v3795_v22 = vpop.f32.mrb[1].mxu0 }
  0xfa   : > { %v4517_v14 = vpack.c.bf16 %v775_v11, %v775_v11  ;;  %v3804_v15 = vpop.f32.mrb[3].mxu1  ;;  %v702_v23 = vpop.f32.mrb[2].mxu0 }
  0xfb   : > { %v3796_v24 = vpop.f32.mrb[3].mxu0 }
  0xfc   : > { %786 = vrot.lane.b32.xlu1 %v4517_v14, %s5216_s25  ;;  %782 = vrot.lane.b32.xlu0 %v4517_v14, %s5218_s0 }
 0x100   : > { %788 = vrot.lane.b32.xlu1 %v4517_v14, %s5214_s26  ;;  %784 = vrot.lane.b32.xlu0 %v4517_v14, %s5220_s27 }
 0x16e   : > { %v4527_v16 = vpop.permute.xlu1 %786  ;;  %v4529_v17 = vpop.permute.xlu0 %782 }
 0x16f   : > { %837 = vrot.lane.b32.xlu0 %v4529_v17, %s5214_s26 }
 0x172   : > { %v789_v18 = vpop.permute.xlu1 %788  ;;  %v4533_v19 = vpop.permute.xlu0 %784 }
 0x173   : > { %v795_v20 = vsel %vm790_vm2, %v789_v18, 0  ;;  %933 = vrot.lane.b32.xlu0 %v4527_v16, %s5214_s26  ;;  %885 = vrot.lane.b32.xlu1 %v4533_v19, %s5214_s26 }
 0x174   : > { %3806 = vmatpush3.bf16.xpose.msra.mxu0 %v795_v20 }
 0x175   : > { %3817 = vmatprep.subr.bf16.mxu0 %v4312_v1 }
 0x17b   : > { %3808 = vmatmul.mubr.msk.bf16.vlgmr.msra.gmra.mrb[4].mxu0 %vm790_vm2, %v4517_v14 }
 0x17c   : > { %3819 = vmatprep.mubr.msk.bf16.mxu0 %vm4313_vm0, %v4312_v1 }
 0x1e1   : > { %v838_v25 = vpop.permute.xlu0 %837 }
 0x1e2   : > { %v843_v26 = vsel %vm790_vm2, %v838_v25, 0 }
 0x1e3   : > { %3812 = vmatpush3.bf16.xpose.msra.mxu1 %v843_v26 }
 0x1e4   : > { %3823 = vmatprep.subr.bf16.mxu1 %v4312_v1 }
 0x1e5   : > { %v886_v27 = vpop.permute.xlu1 %885  ;;  %v934_v29 = vpop.permute.xlu0 %933 }
 0x1e6   : > { %v891_v28 = vsel %vm790_vm2, %v886_v27, 0  ;;  %v939_v30 = vsel %vm790_vm2, %v934_v29, 0 }
 0x1e7   : > { %3818 = vmatpush3.bf16.xpose.msra.mxu0 %v891_v28 }
 0x1e8   : > { %3829 = vmatprep.subr.bf16.mxu0 %v4312_v1 }
 0x1ea   : > { %3814 = vmatmul.mubr.msk.bf16.vlgmr.msra.gmra.mrb[4].mxu1 %vm790_vm2, %v4529_v17 }
 0x1eb   : > { %3824 = vmatpush3.bf16.xpose.msra.mxu1 %v939_v30  ;;  %3825 = vmatprep.mubr.msk.bf16.mxu1 %vm4313_vm0, %v4312_v1 }
 0x1ec   : > { %3835 = vmatprep.subr.bf16.mxu1 %v4312_v1 }
 0x1ee   : > { %3820 = vmatmul.mubr.msk.bf16.vlgmr.msra.gmra.mrb[8].mxu0 %vm790_vm2, %v4533_v19 }
 0x1ef   : > { %3831 = vmatprep.mubr.msk.bf16.mxu0 %vm4313_vm0, %v4312_v1 }
 0x1f2   : > { %3826 = vmatmul.mubr.msk.bf16.vlgmr.msra.gmra.mrb[8].mxu1 %vm790_vm2, %v4527_v16 }
 0x1f3   : > { %3837 = vmatprep.mubr.msk.bf16.mxu1 %vm4313_vm0, %v4312_v1 }
 0x24e   : > { %v831_v38 = vpop.f32.mrb[4].mxu0 }
 0x24f   : > { %v981_v39 = vmul.f32 0.35355338, %v831_v38  ;;  %v3809_v40 = vpop.f32.mrb[5].mxu0 }
 0x250   : > { %v834_v41 = vpop.f32.mrb[6].mxu0 }
 0x251   : > { %v3810_v42 = vpop.f32.mrb[7].mxu0  ;;  %v991_v43 = vadd.f32 %v4575_v37, %v981_v39 }
 0x253   : > { %v995_v44 = vsel %vm790_vm2, %v991_v43, -inf }
 0x254   : > { %996 = vmax.xlane.f32.xlu1 %v995_v44 }
 0x2bd   : > { %v879_v45 = vpop.f32.mrb[4].mxu1 }
 0x2be   : > { %v982_v46 = vmul.f32 0.35355338, %v879_v45  ;;  %v3815_v47 = vpop.f32.mrb[5].mxu1 }
 0x2bf   : > { %v882_v48 = vpop.f32.mrb[6].mxu1 }
 0x2c0   : > { %v3816_v49 = vpop.f32.mrb[7].mxu1  ;;  %v992_v50 = vadd.f32 %v4575_v37, %v982_v46 }
 0x2c1   : > { %v927_v51 = vpop.f32.mrb[8].mxu0 }
 0x2c2   : > { %v983_v52 = vmul.f32 0.35355338, %v927_v51  ;;  %v3821_v53 = vpop.f32.mrb[9].mxu0  ;;  %v998_v54 = vsel %vm790_vm2, %v992_v50, -inf }
 0x2c3   : > { %v930_v55 = vpop.f32.mrb[10].mxu0  ;;  %999 = vmax.xlane.f32.xlu0 %v998_v54 }
 0x2c4   : > { %v3822_v56 = vpop.f32.mrb[11].mxu0  ;;  %v993_v57 = vadd.f32 %v4575_v37, %v983_v52  ;;  %v4146_v52 = vld [vmem:[%s5185_s5] sm:$0xff]  }
 0x2c5   : > { %v975_v58 = vpop.f32.mrb[8].mxu1 }
 0x2c6   : > { %v984_v59 = vmul.f32 0.35355338, %v975_v58  ;;  %v3827_v60 = vpop.f32.mrb[9].mxu1  ;;  %v1001_v61 = vsel %vm790_vm2, %v993_v57, -inf }
 0x2c7   : > { %1002 = vmax.xlane.f32.xlu0 %v1001_v61  ;;  %v978_v62 = vpop.f32.mrb[10].mxu1 }
 0x2c8   : > { %v3828_v63 = vpop.f32.mrb[11].mxu1  ;;  %v994_v0 = vadd.f32 %v4575_v37, %v984_v59 }
 0x2ca   : > { %v1004_v2 = vsel %vm790_vm2, %v994_v0, -inf }
 0x2cb   : > { %1005 = vmax.xlane.f32.xlu1 %v1004_v2 }
 0x2dc   : > { %1092 = vrot.lane.b32.xlu1 %v4529_v17, %s5206_s24 }
 0x2dd   : > { %1043 = vrot.lane.b32.xlu0 %v4517_v14, %s5206_s24 }
 0x2e1   : > { %v997_v4 = vpop.xlane.xlu1 %996 }
 0x2e2   : > { %v1007_v5 = vsub.f32 %v991_v43, %v997_v4 }
 0x2e4   : > { %v1011_v6 = vmul.f32 1.442695, %v1007_v5 }
 0x2e6   : > { %4172 = vpow2.f32 %v1011_v6 }
 0x2f0   : > { %v4173_v7 = vpop.eup %4172 }
 0x2f1   : > { %v1019_v8 = vsel %vm790_vm2, %v4173_v7, 0.0 }
 0x2fc   : > { %1020 = vadd.xlane.f32.xlu0 %v1019_v8  ;;  %v3590_v8 = vld [vmem:[%s5190_s10] ss:$0 sm:$0xff] }
 0x350   : > { %v1000_v9 = vpop.xlane.xlu0 %999 }
 0x351   : > { %v1008_v10 = vsub.f32 %v992_v50, %v1000_v9  ;;  %v700_v9 = vadd.f32 %v3590_v8, %v4545_v21  ;;  %v4649_v21 = vld [vmem:[%s5238_s6] ss:$0 sm:$0xff]  ;;  %s5244_s6 = smov 104  }
 0x353   : > { %v1013_v11 = vmul.f32 1.442695, %v1008_v10 }
 0x354   : > { %v1003_v12 = vpop.xlane.xlu0 %1002 }
 0x355   : > { %4174 = vpow2.f32 %v1013_v11  ;;  %v1009_v13 = vsub.f32 %v993_v57, %v1003_v12  ;;  %v4147_v57 = vld [vmem:[%s5185_s5 + $0x8] sm:$0xff]  }
 0x357   : > { %v1015_v15 = vmul.f32 1.442695, %v1009_v13  ;;  %v4633_v13 = vpack.c.bf16 %v700_v9, %v700_v9 }
 0x358   : > { %v1044_v17 = vpop.permute.xlu0 %1043  ;;  %v1006_v18 = vpop.xlane.xlu1 %1005 }
 0x359   : > { %4176 = vpow2.f32 %v1015_v15  ;;  %v1050_v14 = vsel %vm1048_vm3, %v1044_v17, 0  ;;  %v1010_v20 = vsub.f32 %v994_v0, %v1006_v18 }
 0x35a   : > { %3830 = vmatpush3.bf16.msra.mxu0 %v1050_v14 }
 0x35b   : > { %v1017_v22 = vmul.f32 1.442695, %v1010_v20  ;;  %3841 = vmatprep.subr.bf16.mxu0 %v4312_v1  ;;  %v4640_v20 = vsel %vm790_vm2, %v4633_v13, 0 }
 0x35c   : > { %v1093_v23 = vpop.permute.xlu1 %1092 }
 0x35d   : > { %4178 = vpow2.f32 %v1017_v22  ;;  %v1098_v24 = vsel %vm1048_vm3, %v1093_v23, 0 }
 0x35e   : > { %3836 = vmatpush3.bf16.msra.mxu1 %v1098_v24 }
 0x35f   : > { %v4175_v25 = vpop.eup %4174  ;;  %3847 = vmatprep.subr.bf16.mxu1 %v4312_v1 }
 0x360   : > { %v1022_v26 = vsel %vm790_vm2, %v4175_v25, 0.0 }
 0x361   : > { %1023 = vadd.xlane.f32.xlu1 %v1022_v26 }
 0x363   : > { %v4177_v27 = vpop.eup %4176 }
 0x364   : > { %v1025_v28 = vsel %vm790_vm2, %v4177_v27, 0.0 }
 0x365   : > { %1026 = vadd.xlane.f32.xlu0 %v1025_v28 }
 0x367   : > { %v4179_v29 = vpop.eup %4178 }
 0x368   : > { %v1028_v30 = vsel %vm790_vm2, %v4179_v29, 0.0 }
 0x369   : > { %1029 = vadd.xlane.f32.xlu1 %v1028_v30 }
 0x37a   : > { %1140 = vrot.lane.b32.xlu1 %v4533_v19, %s5206_s24 }
 0x37b   : > { %1188 = vrot.lane.b32.xlu0 %v4527_v16, %s5206_s24  ;;  %s5239_s24 = smov 16  }
 0x389   : > { %v1021_v31 = vpop.xlane.xlu0 %1020 }
 0x38a   : > { %4180 = vrcp.f32 %v1021_v31 }
 0x394   : > { %v4181_v32 = vpop.eup %4180 }
 0x395   : > { %v1035_v33 = vmul.f32 %v4181_v32, %v4173_v7 }
 0x397   : > { %v1039_v35 = vpack.c.bf16 %v1035_v33, %v1035_v33 }
 0x399   : > { %3832 = vmatmul.mubr.msk.bf16.vlgmr.msra.gmra.mrb[12].mxu0 %vm790_vm2, %v1039_v35  ;;  %v4149_v35 = vld [vmem:[%s5187_s7 + $0x8] sm:$0xff]  }
 0x39a   : > { %3843 = vmatprep.mubr.msk.bf16.mxu0 %vm4313_vm0, %v4312_v1 }
 0x3ee   : > { %v1024_v38 = vpop.xlane.xlu1 %1023 }
 0x3ef   : > { %4182 = vrcp.f32 %v1024_v38 }
 0x3f2   : > { %v1027_v39 = vpop.xlane.xlu0 %1026 }
 0x3f3   : > { %4184 = vrcp.f32 %v1027_v39 }
 0x3f6   : > { %v1030_v40 = vpop.xlane.xlu1 %1029  ;;  %v1189_v16 = vpop.permute.xlu0 %1188 }
 0x3f7   : > { %4186 = vrcp.f32 %v1030_v40  ;;  %v1194_v47 = vsel %vm1048_vm3, %v1189_v16, 0 }
 0x3f9   : > { %v4183_v19 = vpop.eup %4182 }
 0x3fa   : > { %v1036_v41 = vmul.f32 %v4183_v19, %v4175_v25  ;;  %v1141_v42 = vpop.permute.xlu1 %1140  ;;  %v4672_v19 = vld [vmem:[%s5197_s17] sm:$0x7] }
 0x3fb   : > { %v1146_v43 = vsel %vm1048_vm3, %v1141_v42, 0  ;;  %v4681_v42 = vrot.slane %v4672_v19, %v4572_v36 }
 0x3fc   : > { %3842 = vmatpush3.bf16.msra.mxu0 %v1146_v43  ;;  %v1040_v44 = vpack.c.bf16 %v1036_v41, %v1036_v41  ;;  %v4677_v41 = vld [vmem:[%s5198_s18] sm:$0x7] }
 0x3fd   : > { %v4185_v45 = vpop.eup %4184  ;;  %3853 = vmatprep.subr.bf16.mxu0 %v4312_v1 }
 0x3fe   : > { %v1037_v46 = vmul.f32 %v4185_v45, %v4177_v27  ;;  %3838 = vmatmul.mubr.msk.bf16.vlgmr.msra.gmra.mrb[12].mxu1 %vm790_vm2, %v1040_v44  ;;  %v4685_v44 = vrot.slane %v4677_v41, %v4572_v36  ;;  %v4707_v36 = vld [vmem:[%s5188_s8] ss:$0 sm:$0xff] }
 0x3ff   : > { %3848 = vmatpush3.bf16.msra.mxu1 %v1194_v47  ;;  %3849 = vmatprep.mubr.msk.bf16.mxu1 %vm4313_vm0, %v4312_v1 }
 0x400   : > { %v1041_v48 = vpack.c.bf16 %v1037_v46, %v1037_v46  ;;  %3861 = vmatprep.subr.bf16.mxu1 %v4312_v1 }
 0x401   : > { %v4187_v49 = vpop.eup %4186 }
 0x402   : > { %v1038_v50 = vmul.f32 %v4187_v49, %v4179_v29  ;;  %3844 = vmatmul.mubr.msk.bf16.vlgmr.msra.gmra.mrb[16].mxu0 %vm790_vm2, %v1041_v48 }
 0x403   : > { %3857 = vmatprep.mubr.msk.bf16.mxu0 %vm4313_vm0, %v4312_v1  ;;  %3854 = vmatpush3.bf16.msra.mxu0 %v4146_v52 }
 0x404   : > { %v1042_v51 = vpack.c.bf16 %v1038_v50, %v1038_v50  ;;  %3855 = vmatprep.subr.bf16.mxu0 %v4312_v1 }
 0x406   : > { %3850 = vmatmul.mubr.msk.bf16.vlgmr.msra.gmra.mrb[16].mxu1 %vm790_vm2, %v1042_v51 }
 0x407   : > { %3865 = vmatprep.mubr.msk.bf16.mxu1 %vm4313_vm0, %v4312_v1  ;;  %3856 = vmatpush3.bf16.msra.mxu0 %v4147_v57 }
 0x408   : > { %3869 = vmatprep.subr.bf16.mxu0 %v4312_v1 }
 0x46c   : > { %v1086_v53 = vpop.f32.mrb[12].mxu0 }
 0x46d   : > { %v3833_v54 = vpop.f32.mrb[13].mxu0 }
 0x46e   : > { %v1089_v55 = vpop.f32.mrb[14].mxu0 }
 0x46f   : > { %v3834_v56 = vpop.f32.mrb[15].mxu0 }
 0x4d1   : > { %v1134_v58 = vpop.f32.mrb[12].mxu1 }
 0x4d2   : > { %1237 = vrot.lane.b32.xlu1 %v1134_v58, %s5210_s2  ;;  %v3839_v59 = vpop.f32.mrb[13].mxu1  ;;  %s5240_s2 = smov 8  }
 0x4d3   : > { %v1137_v60 = vpop.f32.mrb[14].mxu1 }
 0x4d4   : > { %v3840_v61 = vpop.f32.mrb[15].mxu1 }
 0x4d5   : > { %v1182_v62 = vpop.f32.mrb[16].mxu0 }
 0x4d6   : > { %1241 = vrot.lane.b32.xlu0 %v1182_v62, %s5212_s23  ;;  %v3845_v63 = vpop.f32.mrb[17].mxu0  ;;  %s5241_s23 = smov 24  }
 0x4d7   : > { %v1185_v0 = vpop.f32.mrb[18].mxu0 }
 0x4d8   : > { %v3846_v2 = vpop.f32.mrb[19].mxu0 }
 0x4d9   : > { %v1230_v4 = vpop.f32.mrb[16].mxu1 }
 0x4da   : > { %1245 = vrot.lane.b32.xlu1 %v1230_v4, %s5208_s20  ;;  %v3851_v5 = vpop.f32.mrb[17].mxu1  ;;  %s5242_s20 = smov 112  }
 0x4db   : > { %v1233_v6 = vpop.f32.mrb[18].mxu1 }
 0x4dc   : > { %v3852_v7 = vpop.f32.mrb[19].mxu1 }
 0x544   : > { %v1238_v10 = vpop.permute.xlu1 %1237 }
 0x545   : > { %v1248_v12 = vsel %vm790_vm2, %v1086_v53, %v1238_v10 }
 0x548   : > { %v1242_v11 = vpop.permute.xlu0 %1241 }
 0x549   : > { %v1250_v15 = vsel %vm1249_vm4, %v1248_v12, %v1242_v11 }
 0x54c   : > { %v1246_v17 = vpop.permute.xlu1 %1245 }
 0x54d   : > { %v1252_v18 = vsel %vm1251_vm5, %v1250_v15, %v1246_v17 }
 0x54e   : > { %v1253_v14 = vpack.c.bf16 %v1252_v18, %v1252_v18 }
 0x550   : > { %3858 = vmatmul.mubr.msk.bf16.vlgmr.msra.gmra.mrb[20].mxu0 %vm661_vm1, %v1253_v14 }
 0x551   : > { %3870 = vmatpush3.bf16.xpose.msra.mxu0 %v4640_v20  ;;  %3871 = vmatprep.mubr.msk.bf16.mxu0 %vm4313_vm0, %v4312_v1 }
 0x552   : > { %3881 = vmatprep.subr.bf16.mxu0 %v4312_v1 }
 0x623   : > { %v1314_v22 = vpop.f32.mrb[20].mxu0 }
 0x624   : > { %v1315_v23 = vadd.f32 %v4649_v21, %v1314_v22  ;;  %v3859_v24 = vpop.f32.mrb[21].mxu0 }
 0x625   : > { %v1317_v25 = vpop.f32.mrb[22].mxu0 }
 0x626   : > { %v3860_v26 = vpop.f32.mrb[23].mxu0  ;;  %v1320_v27 = vadd.f32 %v1315_v23, %v4493_v3  ;;  %v4148_v3 = vld [vmem:[%s5187_s7] sm:$0xff]  }
 0x627   : > { %3862 = vmatpush3.bf16.msra.mxu1 %v4148_v3 }
 0x628   : > { %v1321_v28 = vsel %vm661_vm1, %v1320_v27, 0.0  ;;  %3863 = vmatprep.subr.bf16.mxu1 %v4312_v1 }
 0x629   : > { %1322 = vadd.xlane.f32.xlu0 %v1321_v28 }
 0x62b   : > { %3864 = vmatpush3.bf16.msra.mxu1 %v4149_v35 }
 0x62c   : > { %3875 = vmatprep.subr.bf16.mxu1 %v4312_v1 }
 0x63f   : > { %707 = vrot.lane.b32.xlu0 %v4633_v13, %s5218_s0 }
 0x643   : > { %711 = vrot.lane.b32.xlu0 %v4633_v13, %s5216_s25 }
 0x6b6   : > { %v1323_v29 = vpop.xlane.xlu0 %1322 }
 0x6b7   : > { %v1325_v30 = vmul.f32 0.03125, %v1323_v29 }
 0x6b9   : > { %v1326_v31 = vsub.f32 %v1320_v27, %v1325_v30 }
 0x6ba   : > { %v4691_v47 = vpop.permute.xlu0 %707 }
 0x6bb   : > { %v1327_v32 = vmul.f32 %v1326_v31, %v1326_v31  ;;  %v4697_v49 = vsel %vm790_vm2, %v4691_v47, 0 }
 0x6bd   : > { %v1328_v33 = vsel %vm661_vm1, %v1327_v32, 0.0 }
 0x6be   : > { %1329 = vadd.xlane.f32.xlu1 %v1328_v33  ;;  %v4724_v58 = vpop.permute.xlu0 %711 }
 0x6bf   : > { %v4728_v61 = vsel %vm790_vm2, %v4724_v58, 0 }
 0x6cf   : > { %709 = vrot.lane.b32.xlu1 %v4633_v13, %s5220_s27 }
 0x74b   : > { %v1330_v38 = vpop.xlane.xlu1 %1329 }
 0x74c   : > { %v1331_v39 = vmul.f32 0.03125, %v1330_v38 }
 0x74e   : > { %v1332_v40 = vadd.f32 1e-05, %v1331_v39 }
 0x74f   : > { %v4710_v54 = vpop.permute.xlu1 %709 }
 0x750   : > { %4188 = vrsqrt.f32 %v1332_v40  ;;  %v4716_v57 = vsel %vm790_vm2, %v4710_v54, 0 }
 0x75a   : > { %v4189_v16 = vpop.eup %4188 }
 0x75b   : > { %v1334_v43 = vmul.f32 %v4189_v16, %v1326_v31 }
 0x75d   : > { %v1339_v45 = vmul.f32 %v4681_v42, %v1334_v43 }
 0x75f   : > { %v4689_v46 = vadd.f32 %v4685_v44, %v1339_v45 }
 0x761   : > { %v1345_v48 = vpack.c.bf16 %v4689_v46, %v4689_v46 }
 0x763   : > { %3866 = vmatmul.mubr.msk.bf16.vlgmr.msra.gmra.mrb[20].mxu1 %vm661_vm1, %v1345_v48 }
 0x764   : > { %3876 = vmatpush3.bf16.xpose.msra.mxu1 %v4697_v49  ;;  %3877 = vmatprep.mubr.msk.bf16.mxu1 %vm4313_vm0, %v4312_v1 }
 0x765   : > { %3887 = vmatprep.subr.bf16.mxu1 %v4312_v1 }
 0x836   : > { %v1406_v50 = vpop.f32.mrb[20].mxu1 }
 0x837   : > { %v1407_v51 = vadd.f32 %v4707_v36, %v1406_v50  ;;  %v3867_v52 = vpop.f32.mrb[21].mxu1 }
 0x838   : > { %v1409_v53 = vpop.f32.mrb[22].mxu1 }
 0x839   : > { %v1412_v55 = vpack.c.bf16 %v1407_v51, %v1407_v51  ;;  %v3868_v56 = vpop.f32.mrb[23].mxu1 }
 0x83b   : > { %1416 = vrot.lane.b32.xlu0 %v1412_v55, %s5220_s27  ;;  %1414 = vrot.lane.b32.xlu1 %v1412_v55, %s5218_s0  ;;  %s5246_s0 = smov 64  }
 0x83c   : > { %3872 = vmatmul.mubr.msk.bf16.vlgmr.msra.gmra.mrb[24].mxu0 %vm790_vm2, %v1412_v55 }
 0x83d   : > { %3882 = vmatpush3.bf16.xpose.msra.mxu0 %v4716_v57  ;;  %3883 = vmatprep.mubr.msk.bf16.mxu0 %vm4313_vm0, %v4312_v1 }
 0x83e   : > { %3893 = vmatprep.subr.bf16.mxu0 %v4312_v1 }
 0x83f   : > { %1418 = vrot.lane.b32.xlu1 %v1412_v55, %s5216_s25  ;;  %s5245_s25 = smov 96  }
 0x8ad   : > { %v1417_v59 = vpop.permute.xlu0 %1416  ;;  %v1415_v60 = vpop.permute.xlu1 %1414 }
 0x8ae   : > { %3878 = vmatmul.mubr.msk.bf16.vlgmr.msra.gmra.mrb[24].mxu1 %vm790_vm2, %v1415_v60  ;;  %3884 = vmatmul.mubr.msk.bf16.vlgmr.msra.gmra.mrb[28].mxu0 %vm790_vm2, %v1417_v59 }
 0x8af   : > { %3888 = vmatpush3.bf16.xpose.msra.mxu1 %v4728_v61  ;;  %3889 = vmatprep.mubr.msk.bf16.mxu1 %vm4313_vm0, %v4312_v1 }
 0x8b0   : > { %3895 = vmatprep.mubr.msk.bf16.mxu0 %vm4313_vm0, %v4312_v1  ;;  %3899 = vmatprep.subr.bf16.mxu1 %v4312_v1 }
 0x8b1   : > { %v1419_v62 = vpop.permute.xlu1 %1418 }
 0x8b6   : > { %3890 = vmatmul.mubr.msk.bf16.vlgmr.msra.gmra.mrb[28].mxu1 %vm790_vm2, %v1419_v62 }
 0x8b7   : > { %3901 = vmatprep.mubr.msk.bf16.mxu1 %vm4313_vm0, %v4312_v1 }
 0x90f   : > { %v1460_v63 = vpop.f32.mrb[24].mxu0 }
 0x910   : > { %v1604_v0 = vmul.f32 0.35355338, %v1460_v63  ;;  %v3873_v2 = vpop.f32.mrb[25].mxu0 }
 0x911   : > { %v1463_v4 = vpop.f32.mrb[26].mxu0 }
 0x912   : > { %v3874_v5 = vpop.f32.mrb[27].mxu0  ;;  %v1608_v6 = vadd.f32 %v1604_v0, %v4575_v37 }
 0x914   : > { %v1612_v7 = vsel %vm790_vm2, %v1608_v6, -inf }
 0x915   : > { %1613 = vmax.xlane.f32.xlu0 %v1612_v7 }
 0x981   : > { %v1506_v8 = vpop.f32.mrb[24].mxu1  ;;  %v1552_v9 = vpop.f32.mrb[28].mxu0 }
 0x982   : > { %v1605_v10 = vmul.f32 0.35355338, %v1506_v8  ;;  %v1606_v11 = vmul.f32 0.35355338, %v1552_v9  ;;  %v3879_v12 = vpop.f32.mrb[25].mxu1  ;;  %v3885_v15 = vpop.f32.mrb[29].mxu0 }
 0x983   : > { %v1509_v17 = vpop.f32.mrb[26].mxu1  ;;  %v1555_v18 = vpop.f32.mrb[30].mxu0 }
 0x984   : > { %v3880_v14 = vpop.f32.mrb[27].mxu1  ;;  %v3886_v22 = vpop.f32.mrb[31].mxu0  ;;  %v1610_v23 = vadd.f32 %v1606_v11, %v4575_v37  ;;  %v1609_v24 = vadd.f32 %v1605_v10, %v4575_v37 }
 0x986   : > { %v1618_v25 = vsel %vm790_vm2, %v1610_v23, -inf  ;;  %v1615_v26 = vsel %vm790_vm2, %v1609_v24, -inf }
 0x987   : > { %1619 = vmax.xlane.f32.xlu0 %v1618_v25  ;;  %1616 = vmax.xlane.f32.xlu1 %v1615_v26 }
 0x989   : > { %v1598_v27 = vpop.f32.mrb[28].mxu1 }
 0x98a   : > { %v1607_v28 = vmul.f32 0.35355338, %v1598_v27  ;;  %v3891_v29 = vpop.f32.mrb[29].mxu1 }
 0x98b   : > { %v1601_v30 = vpop.f32.mrb[30].mxu1 }
 0x98c   : > { %v3892_v31 = vpop.f32.mrb[31].mxu1  ;;  %v1611_v32 = vadd.f32 %v1607_v28, %v4575_v37 }
 0x98e   : > { %v1621_v33 = vsel %vm790_vm2, %v1611_v32, -inf }
 0x98f   : > { %1622 = vmax.xlane.f32.xlu0 %v1621_v33  ;;  %v4151_v33 = vld [vmem:[%s5191_s11 + $0x8] sm:$0xff]  }
 0x998   : > { %1660 = vrot.lane.b32.xlu1 %v4633_v13, %s5214_s26 }
 0x9a2   : > { %v1614_v3 = vpop.xlane.xlu0 %1613 }
 0x9a3   : > { %v1624_v35 = vsub.f32 %v1608_v6, %v1614_v3 }
 0x9a5   : > { %v1628_v38 = vmul.f32 1.442695, %v1624_v35 }
 0x9a7   : > { %4190 = vpow2.f32 %v1628_v38 }
 0x9b1   : > { %v4191_v39 = vpop.eup %4190 }
 0x9b2   : > { %v1636_v40 = vsel %vm790_vm2, %v4191_v39, 0.0 }
 0x9bc   : > { %1637 = vadd.xlane.f32.xlu1 %v1636_v40 }
 0xa14   : > { %v1620_v16 = vpop.xlane.xlu0 %1619  ;;  %v1617_v43 = vpop.xlane.xlu1 %1616 }
 0xa15   : > { %v1626_v45 = vsub.f32 %v1610_v23, %v1620_v16  ;;  %v1625_v48 = vsub.f32 %v1609_v24, %v1617_v43 }
 0xa17   : > { %v1632_v50 = vmul.f32 1.442695, %v1626_v45  ;;  %v1630_v51 = vmul.f32 1.442695, %v1625_v48 }
 0xa18   : > { %v1661_v52 = vpop.permute.xlu1 %1660 }
 0xa19   : > { %4192 = vpow2.f32 %v1632_v50  ;;  %v4753_v53 = vsel %vm1048_vm3, %v1661_v52, 0 }
 0xa1a   : > { %4194 = vpow2.f32 %v1630_v51  ;;  %3894 = vmatpush3.bf16.msra.mxu0 %v4753_v53 }
 0xa1b   : > { %3905 = vmatprep.subr.bf16.mxu0 %v4312_v1 }
 0xa1c   : > { %v1623_v13 = vpop.xlane.xlu0 %1622 }
 0xa1d   : > { %v1627_v55 = vsub.f32 %v1611_v32, %v1623_v13  ;;  %v4150_v32 = vld [vmem:[%s5191_s11] sm:$0xff]  }
 0xa1f   : > { %v1634_v56 = vmul.f32 1.442695, %v1627_v55 }
 0xa21   : > { %4196 = vpow2.f32 %v1634_v56 }
 0xa23   : > { %v4193_v59 = vpop.eup %4192 }
 0xa24   : > { %v4195_v60 = vpop.eup %4194  ;;  %v1642_v62 = vsel %vm790_vm2, %v4193_v59, 0.0 }
 0xa25   : > { %1643 = vadd.xlane.f32.xlu1 %v1642_v62  ;;  %v1639_v63 = vsel %vm790_vm2, %v4195_v60, 0.0 }
 0xa26   : > { %1640 = vadd.xlane.f32.xlu0 %v1639_v63 }
 0xa2b   : > { %v4197_v0 = vpop.eup %4196 }
 0xa2c   : > { %v1645_v2 = vsel %vm790_vm2, %v4197_v0, 0.0 }
 0xa2d   : > { %1646 = vadd.xlane.f32.xlu0 %v1645_v2 }
 0xa36   : > { %1756 = vrot.lane.b32.xlu1 %v4710_v54, %s5214_s26 }
 0xa3a   : > { %1804 = vrot.lane.b32.xlu1 %v4724_v58, %s5214_s26 }
 0xa43   : > { %1708 = vrot.lane.b32.xlu0 %v4691_v47, %s5214_s26 }
 0xa49   : > { %v1638_v4 = vpop.xlane.xlu1 %1637 }
 0xa4a   : > { %4198 = vrcp.f32 %v1638_v4 }
 0xa54   : > { %v4199_v5 = vpop.eup %4198 }
 0xa55   : > { %v1652_v6 = vmul.f32 %v4199_v5, %v4191_v39 }
 0xa57   : > { %v1656_v7 = vpack.c.bf16 %v1652_v6, %v1652_v6 }
 0xa59   : > { %3896 = vmatmul.mubr.msk.bf16.vlgmr.msra.gmra.mrb[32].mxu0 %vm790_vm2, %v1656_v7 }
 0xa5a   : > { %3907 = vmatprep.mubr.msk.bf16.mxu0 %vm4313_vm0, %v4312_v1 }
 0xab2   : > { %v1644_v8 = vpop.xlane.xlu1 %1643 }
 0xab3   : > { %4200 = vrcp.f32 %v1644_v8  ;;  %v1641_v9 = vpop.xlane.xlu0 %1640 }
 0xab4   : > { %4202 = vrcp.f32 %v1641_v9 }
 0xab6   : > { %v1757_v54 = vpop.permute.xlu1 %1756 }
 0xab7   : > { %v4770_v58 = vsel %vm1048_vm3, %v1757_v54, 0 }
 0xab8   : > { %3906 = vmatpush3.bf16.msra.mxu0 %v4770_v58 }
 0xab9   : > { %3917 = vmatprep.subr.bf16.mxu0 %v4312_v1 }
 0xaba   : > { %v1647_v47 = vpop.xlane.xlu0 %1646  ;;  %v1805_v14 = vpop.permute.xlu1 %1804 }
 0xabb   : > { %4204 = vrcp.f32 %v1647_v47  ;;  %v4781_v24 = vsel %vm1048_vm3, %v1805_v14, 0  ;;  %v4155_v14 = vld [vmem:[%s5195_s15 + $0x8] sm:$0xff]  }
 0xabd   : > { %v4201_v10 = vpop.eup %4200 }
 0xabe   : > { %v4203_v11 = vpop.eup %4202  ;;  %v1654_v12 = vmul.f32 %v4201_v10, %v4193_v59  ;;  %v1709_v15 = vpop.permute.xlu0 %1708 }
 0xabf   : > { %v1653_v17 = vmul.f32 %v4203_v11, %v4195_v60  ;;  %v4775_v18 = vsel %vm1048_vm3, %v1709_v15, 0  ;;  %v4152_v15 = vld [vmem:[%s5193_s13] sm:$0xff]  }
 0xac0   : > { %3900 = vmatpush3.bf16.msra.mxu1 %v4775_v18  ;;  %v1658_v22 = vpack.c.bf16 %v1654_v12, %v1654_v12 }
 0xac1   : > { %v1657_v23 = vpack.c.bf16 %v1653_v17, %v1653_v17  ;;  %3911 = vmatprep.subr.bf16.mxu1 %v4312_v1  ;;  %v4153_v17 = vld [vmem:[%s5193_s13 + $0x8] sm:$0xff]  }
 0xac2   : > { %3908 = vmatmul.mubr.msk.bf16.vlgmr.msra.gmra.mrb[36].mxu0 %vm790_vm2, %v1658_v22 }
 0xac3   : > { %3902 = vmatmul.mubr.msk.bf16.vlgmr.msra.gmra.mrb[32].mxu1 %vm790_vm2, %v1657_v23  ;;  %3921 = vmatprep.mubr.msk.bf16.mxu0 %vm4313_vm0, %v4312_v1 }
 0xac4   : > { %3912 = vmatpush3.bf16.msra.mxu1 %v4781_v24  ;;  %3913 = vmatprep.mubr.msk.bf16.mxu1 %vm4313_vm0, %v4312_v1 }
 0xac5   : > { %v4205_v25 = vpop.eup %4204  ;;  %3925 = vmatprep.subr.bf16.mxu1 %v4312_v1  ;;  %3918 = vmatpush3.bf16.msra.mxu0 %v4150_v32 }
 0xac6   : > { %v1655_v26 = vmul.f32 %v4205_v25, %v4197_v0  ;;  %3919 = vmatprep.subr.bf16.mxu0 %v4312_v1  ;;  %v4813_v0 = vld [vmem:[%s5192_s12] ss:$0 sm:$0xff] }
 0xac8   : > { %v1659_v27 = vpack.c.bf16 %v1655_v26, %v1655_v26  ;;  %v1950_v26 = vsub.s32 1, %v4569_v34 }
 0xac9   : > { %3920 = vmatpush3.bf16.msra.mxu0 %v4151_v33 }
 0xaca   : > { %3933 = vmatprep.subr.bf16.mxu0 %v4312_v1 }
 0xacb   : > { %3914 = vmatmul.mubr.msk.bf16.vlgmr.msra.gmra.mrb[36].mxu1 %vm790_vm2, %v1659_v27  ;;  %v4837_v27 = vrot.slane %v4672_v19, %v1950_v26 }
 0xacc   : > { %3929 = vmatprep.mubr.msk.bf16.mxu1 %vm4313_vm0, %v4312_v1  ;;  %3926 = vmatpush3.bf16.msra.mxu1 %v4152_v15 }
 0xacd   : > { %3927 = vmatprep.subr.bf16.mxu1 %v4312_v1 }
 0xad0   : > { %3928 = vmatpush3.bf16.msra.mxu1 %v4153_v17 }
 0xad1   : > { %3945 = vmatprep.subr.bf16.mxu1 %v4312_v1 }
 0xb2c   : > { %v1702_v28 = vpop.f32.mrb[32].mxu0 }
 0xb2d   : > { %v3897_v29 = vpop.f32.mrb[33].mxu0 }
 0xb2e   : > { %v1705_v30 = vpop.f32.mrb[34].mxu0 }
 0xb2f   : > { %v3898_v31 = vpop.f32.mrb[35].mxu0  ;;  %v4840_v30 = vrot.slane %v4677_v41, %v1950_v26 }
 0xb95   : > { %v1798_v3 = vpop.f32.mrb[36].mxu0 }
 0xb96   : > { %1857 = vrot.lane.b32.xlu1 %v1798_v3, %s5239_s24  ;;  %v1750_v35 = vpop.f32.mrb[32].mxu1  ;;  %v3909_v38 = vpop.f32.mrb[37].mxu0  ;;  %v4156_v3 = vld [vmem:[%s5195_s15 + $0x10] sm:$0xff]  }
 0xb97   : > { %v1801_v39 = vpop.f32.mrb[38].mxu0  ;;  %1853 = vrot.lane.b32.xlu0 %v1750_v35, %s5240_s2  ;;  %v3903_v40 = vpop.f32.mrb[33].mxu1  ;;  %v4157_v35 = vld [vmem:[%s5195_s15 + $0x18] sm:$0xff]   ;;  %v4858_v38 = vld [vmem:[%s5194_s14] ss:$0 sm:$0xff] }
 0xb98   : > { %v1753_v16 = vpop.f32.mrb[34].mxu1  ;;  %v3910_v43 = vpop.f32.mrb[39].mxu0 }
 0xb99   : > { %v3904_v45 = vpop.f32.mrb[35].mxu1 }
 0xb9e   : > { %v1846_v48 = vpop.f32.mrb[36].mxu1 }
 0xb9f   : > { %1861 = vrot.lane.b32.xlu0 %v1846_v48, %s5241_s23  ;;  %v3915_v50 = vpop.f32.mrb[37].mxu1 }
 0xba0   : > { %v1849_v51 = vpop.f32.mrb[38].mxu1 }
 0xba1   : > { %v3916_v52 = vpop.f32.mrb[39].mxu1  ;;  %v4867_v51 = vld [vmem:[%s5196_s16] ss:$0 sm:$0xff] }
 0xc08   : > { %v1858_v56 = vpop.permute.xlu1 %1857 }
 0xc09   : > { %v1854_v13 = vpop.permute.xlu0 %1853 }
 0xc0a   : > { %v1864_v55 = vsel %vm790_vm2, %v1702_v28, %v1854_v13 }
 0xc0b   : > { %v1865_v59 = vsel %vm1249_vm4, %v1864_v55, %v1858_v56 }
 0xc11   : > { %v1862_v60 = vpop.permute.xlu0 %1861 }
 0xc12   : > { %v1866_v62 = vsel %vm1251_vm5, %v1865_v59, %v1862_v60 }
 0xc13   : > { %v1867_v63 = vpack.c.bf16 %v1866_v62, %v1866_v62 }
 0xc15   : > { %3922 = vmatmul.mubr.msk.bf16.vlgmr.msra.gmra.mrb[40].mxu0 %vm661_vm1, %v1867_v63 }
 0xc16   : > { %3941 = vmatprep.mubr.msk.bf16.mxu0 %vm4313_vm0, %v4312_v1 }
 0xce8   : > { %v1928_v2 = vpop.f32.mrb[40].mxu0 }
 0xce9   : > { %v1929_v4 = vadd.f32 %v4813_v0, %v1928_v2  ;;  %v3923_v5 = vpop.f32.mrb[41].mxu0 }
 0xcea   : > { %v1931_v6 = vpop.f32.mrb[42].mxu0 }
 0xceb   : > { %v3924_v7 = vpop.f32.mrb[43].mxu0  ;;  %v1934_v8 = vadd.f32 %v1929_v4, %v4689_v46  ;;  %v4154_v46 = vld [vmem:[%s5195_s15] sm:$0xff]  }
 0xcec   : > { %3934 = vmatpush3.bf16.msra.mxu0 %v4154_v46  ;;  %v4158_v7 = vld [vmem:[%s5234_s29] sm:$0xff]  }
 0xced   : > { %v1935_v9 = vsel %vm661_vm1, %v1934_v8, 0.0  ;;  %3935 = vmatprep.subr.bf16.mxu0 %v4312_v1 }
 0xcee   : > { %1936 = vadd.xlane.f32.xlu1 %v1935_v9 }
 0xcf0   : > { %3936 = vmatpush3.bf16.msra.mxu0 %v4155_v14 }
 0xcf1   : > { %3937 = vmatprep.subr.bf16.mxu0 %v4312_v1 }
 0xcf4   : > { %3938 = vmatpush3.bf16.msra.mxu0 %v4156_v3 }
 0xcf5   : > { %3939 = vmatprep.subr.bf16.mxu0 %v4312_v1 }
 0xcf8   : > { %3940 = vmatpush3.bf16.msra.mxu0 %v4157_v35 }
 0xcf9   : > { %3959 = vmatprep.subr.bf16.mxu0 %v4312_v1 }
 0xd7b   : > { %v1937_v54 = vpop.xlane.xlu1 %1936 }
 0xd7c   : > { %v1938_v47 = vmul.f32 0.03125, %v1937_v54 }
 0xd7e   : > { %v1939_v10 = vsub.f32 %v1934_v8, %v1938_v47  ;;  %v4159_v8 = vld [vmem:[%s5234_s29 + $0x8] sm:$0xff]  }
 0xd80   : > { %v1940_v11 = vmul.f32 %v1939_v10, %v1939_v10 }
 0xd82   : > { %v1941_v12 = vsel %vm661_vm1, %v1940_v11, 0.0 }
 0xd83   : > { %1942 = vadd.xlane.f32.xlu0 %v1941_v12 }
 0xe10   : > { %v1943_v22 = vpop.xlane.xlu0 %1942 }
 0xe11   : > { %v1944_v23 = vmul.f32 0.03125, %v1943_v22 }
 0xe13   : > { %v1945_v25 = vadd.f32 1e-05, %v1944_v23 }
 0xe15   : > { %4206 = vrsqrt.f32 %v1945_v25 }
 0xe1f   : > { %v4207_v28 = vpop.eup %4206 }
 0xe20   : > { %v1947_v29 = vmul.f32 %v4207_v28, %v1939_v10  ;;  %v2126_v10 = vsub.s32 2, %v4569_v34  ;;  %v3636_v34 = vld [vmem:[%s5184_s4] ss:$0 sm:$0xff] }
 0xe22   : > { %v1952_v31 = vmul.f32 %v4837_v27, %v1947_v29  ;;  %v4882_v11 = vrot.slane %v4672_v19, %v2126_v10  ;;  %v4885_v17 = vrot.slane %v4677_v41, %v2126_v10 }
 0xe24   : > { %v1957_v32 = vadd.f32 %v4840_v30, %v1952_v31 }
 0xe26   : > { %v1958_v33 = vpack.c.bf16 %v1957_v32, %v1957_v32 }
 0xe28   : > { %3930 = vmatmul.mubr.msk.bf16.vlgmr.msra.gmra.mrb[40].mxu1 %vm661_vm1, %v1958_v33 }
 0xe29   : > { %3949 = vmatprep.mubr.msk.bf16.mxu1 %vm4313_vm0, %v4312_v1  ;;  %3946 = vmatpush3.bf16.msra.mxu1 %v4158_v7 }
 0xe2a   : > { %3947 = vmatprep.subr.bf16.mxu1 %v4312_v1 }
 0xe2d   : > { %3948 = vmatpush3.bf16.msra.mxu1 %v4159_v8 }
 0xe2e   : > { %3953 = vmatprep.subr.bf16.mxu1 %v4312_v1 }
 0xefb   : > { %v2019_v39 = vpop.f32.mrb[40].mxu1 }
 0xefc   : > { %v2020_v40 = vadd.f32 %v4858_v38, %v2019_v39  ;;  %v3931_v16 = vpop.f32.mrb[41].mxu1 }
 0xefd   : > { %v2022_v43 = vpop.f32.mrb[42].mxu1 }
 0xefe   : > { %v2025_v45 = vmax.f32 %v2020_v40, 0.0  ;;  %v3932_v48 = vpop.f32.mrb[43].mxu1 }
 0xf00   : > { %v2026_v50 = vpack.c.bf16 %v2025_v45, %v2025_v45 }
 0xf02   : > { %3942 = vmatmul.mubr.msk.bf16.vlgmr.msra.gmra.mrb[44].mxu0 %vm2066_vm6, %v2026_v50 }
 0xf03   : > { %3961 = vmatprep.mubr.msk.bf16.mxu0 %vm4313_vm0, %v4312_v1 }
 0xfd5   : > { %v2104_v52 = vpop.f32.mrb[44].mxu0 }
 0xfd6   : > { %v2105_v13 = vadd.f32 %v4867_v51, %v2104_v52  ;;  %v3943_v55 = vpop.f32.mrb[45].mxu0 }
 0xfd7   : > { %v2107_v56 = vpop.f32.mrb[46].mxu0 }
 0xfd8   : > { %v3944_v59 = vpop.f32.mrb[47].mxu0  ;;  %v2110_v60 = vadd.f32 %v2105_v13, %v1957_v32 }
 0xfda   : > { %v2111_v62 = vsel %vm661_vm1, %v2110_v60, 0.0 }
 0xfdb   : > { %2112 = vadd.xlane.f32.xlu0 %v2111_v62 }
0x1068   : > { %v2113_v63 = vpop.xlane.xlu0 %2112 }
0x1069   : > { %v2114_v2 = vmul.f32 0.03125, %v2113_v63 }
0x106b   : > { %v2115_v4 = vsub.f32 %v2110_v60, %v2114_v2 }
0x106d   : > { %v2116_v5 = vmul.f32 %v2115_v4, %v2115_v4 }
0x106f   : > { %v2117_v6 = vsel %vm661_vm1, %v2116_v5, 0.0 }
0x1070   : > { %2118 = vadd.xlane.f32.xlu1 %v2117_v6 }
0x10fd   : > { %v2119_v9 = vpop.xlane.xlu1 %2118 }
0x10fe   : > { %v2120_v54 = vmul.f32 0.03125, %v2119_v9 }
0x1100   : > { %v2121_v47 = vadd.f32 1e-05, %v2120_v54 }
0x1102   : > { %4208 = vrsqrt.f32 %v2121_v47 }
0x110c   : > { %v4209_v12 = vpop.eup %4208 }
0x110d   : > { %v2123_v15 = vmul.f32 %v4209_v12, %v2115_v4 }
0x110f   : > { %v2128_v46 = vmul.f32 %v4882_v11, %v2123_v15 }
0x1111   : > { %v4889_v14 = vadd.f32 %v4885_v17, %v2128_v46 }
0x1113   : > { %v2134_v22 = vpack.c.bf16 %v4889_v14, %v4889_v14 }
0x1115   : > { %3950 = vmatmul.mubr.msk.bf16.vlgmr.msra.gmra.mrb[44].mxu1 %vm661_vm1, %v2134_v22 }
0x1116   : > { %3955 = vmatprep.mubr.msk.bf16.mxu1 %vm4313_vm0, %v4312_v1 }
0x11e8   : > { %v2195_v19 = vpop.f32.mrb[44].mxu1 }
0x11e9   : > { %v2196_v41 = vadd.f32 %v3636_v34, %v2195_v19  ;;  %v3951_v23 = vpop.f32.mrb[45].mxu1 }
0x11ea   : > { %v2198_v25 = vpop.f32.mrb[46].mxu1 }
0x11eb   : > { %v4899_v26 = vpack.c.bf16 %v2196_v41, %v2196_v41  ;;  %v3952_v28 = vpop.f32.mrb[47].mxu1 }
0x11ed   : > { %2205 = vrot.lane.b32.xlu1 %v4899_v26, %s5242_s20  ;;  %2203 = vrot.lane.b32.xlu0 %v4899_v26, %s5243_s28 }
0x11f1   : > { %2207 = vrot.lane.b32.xlu1 %v4899_v26, %s5244_s6  ;;  %2209 = vrot.lane.b32.xlu0 %v4899_v26, %s5245_s25 }
0x125f   : > { %v4909_v29 = vpop.permute.xlu1 %2205  ;;  %v4911_v31 = vpop.permute.xlu0 %2203 }
0x1260   : > { %2305 = vrot.lane.b32.xlu0 %v4909_v29, %s5245_s25  ;;  %2257 = vrot.lane.b32.xlu1 %v4911_v31, %s5245_s25 }
0x1263   : > { %v4917_v32 = vpop.permute.xlu1 %2207  ;;  %v2210_v33 = vpop.permute.xlu0 %2209 }
0x1264   : > { %v2215_v3 = vsel %vm790_vm2, %v2210_v33, 0  ;;  %2353 = vrot.lane.b32.xlu1 %v4917_v32, %s5245_s25  ;;  %s4322_s25 = smov [#allocation2]  }
0x1265   : > { %3954 = vmatpush3.bf16.xpose.msra.mxu1 %v2215_v3 }
0x1266   : > { %3965 = vmatprep.subr.bf16.mxu1 %v4312_v1 }
0x126c   : > { %3956 = vmatmul.mubr.msk.bf16.vlgmr.msra.gmra.mrb[48].mxu1 %vm790_vm2, %v4899_v26 }
0x126d   : > { %3967 = vmatprep.mubr.msk.bf16.mxu1 %vm4313_vm0, %v4312_v1 }
0x12d2   : > { %v2258_v35 = vpop.permute.xlu1 %2257  ;;  %v2306_v39 = vpop.permute.xlu0 %2305 }
0x12d3   : > { %v2263_v40 = vsel %vm790_vm2, %v2258_v35, 0  ;;  %v2311_v16 = vsel %vm790_vm2, %v2306_v39, 0 }
0x12d4   : > { %3960 = vmatpush3.bf16.xpose.msra.mxu0 %v2263_v40  ;;  %3966 = vmatpush3.bf16.xpose.msra.mxu1 %v2311_v16 }
0x12d5   : > { %3971 = vmatprep.subr.bf16.mxu0 %v4312_v1  ;;  %3977 = vmatprep.subr.bf16.mxu1 %v4312_v1 }
0x12d6   : > { %v2354_v43 = vpop.permute.xlu1 %2353 }
0x12d7   : > { %v2359_v45 = vsel %vm790_vm2, %v2354_v43, 0 }
0x12db   : > { %3962 = vmatmul.mubr.msk.bf16.vlgmr.msra.gmra.mrb[48].mxu0 %vm790_vm2, %v4911_v31  ;;  %3968 = vmatmul.mubr.msk.bf16.vlgmr.msra.gmra.mrb[52].mxu1 %vm790_vm2, %v4909_v29 }
0x12dc   : > { %3972 = vmatpush3.bf16.xpose.msra.mxu0 %v2359_v45  ;;  %3973 = vmatprep.mubr.msk.bf16.mxu0 %vm4313_vm0, %v4312_v1 }
0x12dd   : > { %3979 = vmatprep.mubr.msk.bf16.mxu1 %vm4313_vm0, %v4312_v1  ;;  %3983 = vmatprep.subr.bf16.mxu0 %v4312_v1 }
0x12e3   : > { %3974 = vmatmul.mubr.msk.bf16.vlgmr.msra.gmra.mrb[52].mxu0 %vm790_vm2, %v4917_v32 }
0x12e4   : > { %3985 = vmatprep.mubr.msk.bf16.mxu0 %vm4313_vm0, %v4312_v1 }
0x133f   : > { %v2251_v48 = vpop.f32.mrb[48].mxu1 }
0x1340   : > { %v2401_v50 = vmul.f32 0.35355338, %v2251_v48  ;;  %v3957_v52 = vpop.f32.mrb[49].mxu1 }
0x1341   : > { %v2254_v13 = vpop.f32.mrb[50].mxu1 }
0x1342   : > { %v3958_v55 = vpop.f32.mrb[51].mxu1  ;;  %v2405_v56 = vadd.f32 %v2401_v50, %v4575_v37 }
0x1344   : > { %v2409_v59 = vsel %vm790_vm2, %v2405_v56, -inf }
0x1345   : > { %2410 = vmax.xlane.f32.xlu0 %v2409_v59 }
0x13ae   : > { %v2299_v60 = vpop.f32.mrb[48].mxu0  ;;  %v2347_v62 = vpop.f32.mrb[52].mxu1 }
0x13af   : > { %v2402_v63 = vmul.f32 0.35355338, %v2299_v60  ;;  %v2403_v2 = vmul.f32 0.35355338, %v2347_v62  ;;  %v3963_v4 = vpop.f32.mrb[49].mxu0  ;;  %v3969_v5 = vpop.f32.mrb[53].mxu1 }
0x13b0   : > { %v2302_v6 = vpop.f32.mrb[50].mxu0  ;;  %v2350_v7 = vpop.f32.mrb[54].mxu1 }
0x13b1   : > { %v3964_v8 = vpop.f32.mrb[51].mxu0  ;;  %v3970_v9 = vpop.f32.mrb[55].mxu1  ;;  %v2406_v54 = vadd.f32 %v2402_v63, %v4575_v37  ;;  %v2407_v47 = vadd.f32 %v2403_v2, %v4575_v37 }
0x13b3   : > { %v2412_v10 = vsel %vm790_vm2, %v2406_v54, -inf  ;;  %v2415_v12 = vsel %vm790_vm2, %v2407_v47, -inf }
0x13b4   : > { %2413 = vmax.xlane.f32.xlu1 %v2412_v10  ;;  %2416 = vmax.xlane.f32.xlu0 %v2415_v12 }
0x13b6   : > { %v2395_v15 = vpop.f32.mrb[52].mxu0 }
0x13b7   : > { %v2404_v46 = vmul.f32 0.35355338, %v2395_v15  ;;  %v3975_v22 = vpop.f32.mrb[53].mxu0 }
0x13b8   : > { %v2398_v34 = vpop.f32.mrb[54].mxu0 }
0x13b9   : > { %v3976_v19 = vpop.f32.mrb[55].mxu0  ;;  %v2408_v41 = vadd.f32 %v2404_v46, %v4575_v37 }
0x13bb   : > { %v2418_v23 = vsel %vm790_vm2, %v2408_v41, -inf }
0x13bc   : > { %2419 = vmax.xlane.f32.xlu0 %v2418_v23 }
0x13c5   : > { %2457 = vrot.lane.b32.xlu1 %v4899_v26, %s5246_s0 }
0x13d2   : > { %v2411_v25 = vpop.xlane.xlu0 %2410 }
0x13d3   : > { %v2421_v28 = vsub.f32 %v2405_v56, %v2411_v25 }
0x13d5   : > { %v2425_v33 = vmul.f32 1.442695, %v2421_v28 }
0x13d7   : > { %4210 = vpow2.f32 %v2425_v33  ;;  %v4160_v33 = vld [vmem:[%s5185_s5] sm:$0xff]  }
0x13e1   : > { %v4211_v3 = vpop.eup %4210 }
0x13e2   : > { %v2433_v35 = vsel %vm790_vm2, %v4211_v3, 0.0 }
0x13e9   : > { %2434 = vadd.xlane.f32.xlu1 %v2433_v35 }
0x1441   : > { %v2414_v39 = vpop.xlane.xlu1 %2413  ;;  %v2417_v40 = vpop.xlane.xlu0 %2416 }
0x1442   : > { %v2422_v16 = vsub.f32 %v2406_v54, %v2414_v39  ;;  %v2423_v43 = vsub.f32 %v2407_v47, %v2417_v40 }
0x1444   : > { %v2427_v45 = vmul.f32 1.442695, %v2422_v16  ;;  %v2429_v48 = vmul.f32 1.442695, %v2423_v43  ;;  %v4161_v16 = vld [vmem:[%s5185_s5 + $0x8] sm:$0xff]  }
0x1445   : > { %v2458_v50 = vpop.permute.xlu1 %2457 }
0x1446   : > { %4212 = vpow2.f32 %v2427_v45  ;;  %v2463_v52 = vsel %vm1048_vm3, %v2458_v50, 0 }
0x1447   : > { %4214 = vpow2.f32 %v2429_v48  ;;  %3978 = vmatpush3.bf16.msra.mxu1 %v2463_v52 }
0x1448   : > { %3989 = vmatprep.subr.bf16.mxu1 %v4312_v1 }
0x1449   : > { %v2420_v26 = vpop.xlane.xlu0 %2419 }
0x144a   : > { %v2424_v13 = vsub.f32 %v2408_v41, %v2420_v26 }
0x144c   : > { %v2431_v55 = vmul.f32 1.442695, %v2424_v13 }
0x144e   : > { %4216 = vpow2.f32 %v2431_v55 }
0x1450   : > { %v4213_v56 = vpop.eup %4212 }
0x1451   : > { %v4215_v59 = vpop.eup %4214  ;;  %v2436_v60 = vsel %vm790_vm2, %v4213_v56, 0.0 }
0x1452   : > { %2437 = vadd.xlane.f32.xlu0 %v2436_v60  ;;  %v2439_v62 = vsel %vm790_vm2, %v4215_v59, 0.0 }
0x1453   : > { %2440 = vadd.xlane.f32.xlu1 %v2439_v62 }
0x1458   : > { %v4217_v63 = vpop.eup %4216 }
0x1459   : > { %v2442_v2 = vsel %vm790_vm2, %v4217_v63, 0.0 }
0x145a   : > { %2443 = vadd.xlane.f32.xlu0 %v2442_v2 }
0x1464   : > { %2553 = vrot.lane.b32.xlu1 %v4909_v29, %s5246_s0 }
0x1468   : > { %2601 = vrot.lane.b32.xlu1 %v4917_v32, %s5246_s0 }
0x1470   : > { %2505 = vrot.lane.b32.xlu0 %v4911_v31, %s5246_s0  ;;  %s3679_s0 = sshll.u32 %s4444_s1, 7 }
0x1476   : > { %v2435_v4 = vpop.xlane.xlu1 %2434 }
0x1477   : > { %4218 = vrcp.f32 %v2435_v4 }
0x1481   : > { %v4219_v5 = vpop.eup %4218 }
0x1482   : > { %v2449_v6 = vmul.f32 %v4219_v5, %v4211_v3 }
0x1484   : > { %v2453_v7 = vpack.c.bf16 %v2449_v6, %v2449_v6 }
0x1486   : > { %3980 = vmatmul.mubr.msk.bf16.vlgmr.msra.gmra.mrb[56].mxu1 %vm790_vm2, %v2453_v7 }
0x1487   : > { %3991 = vmatprep.mubr.msk.bf16.mxu1 %vm4313_vm0, %v4312_v1 }
0x14df   : > { %v2438_v8 = vpop.xlane.xlu0 %2437 }
0x14e0   : > { %v2441_v9 = vpop.xlane.xlu1 %2440  ;;  %4220 = vrcp.f32 %v2438_v8 }
0x14e1   : > { %4222 = vrcp.f32 %v2441_v9 }
0x14e4   : > { %v2554_v29 = vpop.permute.xlu1 %2553 }
0x14e5   : > { %v2559_v32 = vsel %vm1048_vm3, %v2554_v29, 0 }
0x14e6   : > { %3990 = vmatpush3.bf16.msra.mxu1 %v2559_v32 }
0x14e7   : > { %v2444_v54 = vpop.xlane.xlu0 %2443  ;;  %4001 = vmatprep.subr.bf16.mxu1 %v4312_v1 }
0x14e8   : > { %4224 = vrcp.f32 %v2444_v54  ;;  %v2602_v22 = vpop.permute.xlu1 %2601 }
0x14e9   : > { %v2607_v41 = vsel %vm1048_vm3, %v2602_v22, 0 }
0x14ea   : > { %v4221_v31 = vpop.eup %4220 }
0x14eb   : > { %v4223_v47 = vpop.eup %4222  ;;  %v2450_v10 = vmul.f32 %v4221_v31, %v4213_v56  ;;  %v2506_v12 = vpop.permute.xlu0 %2505 }
0x14ec   : > { %v2451_v15 = vmul.f32 %v4223_v47, %v4215_v59  ;;  %v2511_v46 = vsel %vm1048_vm3, %v2506_v12, 0 }
0x14ed   : > { %3984 = vmatpush3.bf16.msra.mxu0 %v2511_v46  ;;  %v2454_v34 = vpack.c.bf16 %v2450_v10, %v2450_v10 }
0x14ee   : > { %v2455_v19 = vpack.c.bf16 %v2451_v15, %v2451_v15  ;;  %3995 = vmatprep.subr.bf16.mxu0 %v4312_v1 }
0x14f0   : > { %3992 = vmatmul.mubr.msk.bf16.vlgmr.msra.gmra.mrb[60].mxu1 %vm790_vm2, %v2455_v19  ;;  %3986 = vmatmul.mubr.msk.bf16.vlgmr.msra.gmra.mrb[56].mxu0 %vm790_vm2, %v2454_v34  ;;  %v4162_v34 = vld [vmem:[%s5187_s7] sm:$0xff]  }
0x14f1   : > { %3996 = vmatpush3.bf16.msra.mxu0 %v2607_v41  ;;  %3997 = vmatprep.mubr.msk.bf16.mxu0 %vm4313_vm0, %v4312_v1 }
0x14f2   : > { %v4225_v23 = vpop.eup %4224  ;;  %4005 = vmatprep.mubr.msk.bf16.mxu1 %vm4313_vm0, %v4312_v1  ;;  %4009 = vmatprep.subr.bf16.mxu0 %v4312_v1 }
0x14f3   : > { %v2452_v25 = vmul.f32 %v4225_v23, %v4217_v63  ;;  %4002 = vmatpush3.bf16.msra.mxu1 %v4160_v33 }
0x14f4   : > { %4003 = vmatprep.subr.bf16.mxu1 %v4312_v1 }
0x14f5   : > { %v2456_v28 = vpack.c.bf16 %v2452_v25, %v2452_v25 }
0x14f7   : > { %4004 = vmatpush3.bf16.msra.mxu1 %v4161_v16 }
0x14f8   : > { %3998 = vmatmul.mubr.msk.bf16.vlgmr.msra.gmra.mrb[60].mxu0 %vm790_vm2, %v2456_v28  ;;  %4017 = vmatprep.subr.bf16.mxu1 %v4312_v1 }
0x14f9   : > { %4013 = vmatprep.mubr.msk.bf16.mxu0 %vm4313_vm0, %v4312_v1  ;;  %4010 = vmatpush3.bf16.msra.mxu0 %v4162_v34 }
0x14fa   : > { %4011 = vmatprep.subr.bf16.mxu0 %v4312_v1 }
0x1559   : > { %v2499_v3 = vpop.f32.mrb[56].mxu1 }
0x155a   : > { %v3981_v35 = vpop.f32.mrb[57].mxu1 }
0x155b   : > { %v2502_v39 = vpop.f32.mrb[58].mxu1 }
0x155c   : > { %v3982_v40 = vpop.f32.mrb[59].mxu1 }
0x15c3   : > { %v2595_v43 = vpop.f32.mrb[60].mxu1  ;;  %v2547_v45 = vpop.f32.mrb[56].mxu0 }
0x15c4   : > { %2654 = vrot.lane.b32.xlu1 %v2595_v43, %s5239_s24  ;;  %v3993_v48 = vpop.f32.mrb[61].mxu1  ;;  %2650 = vrot.lane.b32.xlu0 %v2547_v45, %s5240_s2  ;;  %v3987_v50 = vpop.f32.mrb[57].mxu0 }
0x15c5   : > { %v2598_v52 = vpop.f32.mrb[62].mxu1  ;;  %v2550_v26 = vpop.f32.mrb[58].mxu0 }
0x15c6   : > { %v3994_v13 = vpop.f32.mrb[63].mxu1  ;;  %v3988_v55 = vpop.f32.mrb[59].mxu0 }
0x15cb   : > { %v2643_v56 = vpop.f32.mrb[60].mxu0 }
0x15cc   : > { %2658 = vrot.lane.b32.xlu0 %v2643_v56, %s5241_s23  ;;  %v3999_v59 = vpop.f32.mrb[61].mxu0 }
0x15cd   : > { %v2646_v60 = vpop.f32.mrb[62].mxu0 }
0x15ce   : > { %v4000_v62 = vpop.f32.mrb[63].mxu0 }
0x1636   : > { %v2651_v63 = vpop.permute.xlu0 %2650  ;;  %v2655_v4 = vpop.permute.xlu1 %2654 }
0x1637   : > { %v2661_v2 = vsel %vm790_vm2, %v2499_v3, %v2651_v63 }
0x1638   : > { %v2662_v6 = vsel %vm1249_vm4, %v2661_v2, %v2655_v4 }
0x163e   : > { %v2659_v5 = vpop.permute.xlu0 %2658 }
0x163f   : > { %v2663_v7 = vsel %vm1251_vm5, %v2662_v6, %v2659_v5 }
0x1640   : > { %v2664_v8 = vpack.c.bf16 %v2663_v7, %v2663_v7 }
0x1642   : > { %4006 = vmatmul.mubr.msk.bf16.vlgmr.msra.gmra.mrb[64].mxu1 %vm661_vm1, %v2664_v8 }
0x1643   : > { %4018 = vmatpush3.bf16.xpose.msra.mxu1 %v4640_v20  ;;  %4019 = vmatprep.mubr.msk.bf16.mxu1 %vm4313_vm0, %v4312_v1 }
0x1644   : > { %4029 = vmatprep.subr.bf16.mxu1 %v4312_v1 }
0x1715   : > { %v2725_v9 = vpop.f32.mrb[64].mxu1 }
0x1716   : > { %v2726_v29 = vadd.f32 %v4649_v21, %v2725_v9  ;;  %v4007_v32 = vpop.f32.mrb[65].mxu1  ;;  %v4163_v21 = vld [vmem:[%s5187_s7 + $0x8] sm:$0xff]  }
0x1717   : > { %v2728_v54 = vpop.f32.mrb[66].mxu1  ;;  %4012 = vmatpush3.bf16.msra.mxu0 %v4163_v21 }
0x1718   : > { %v4008_v31 = vpop.f32.mrb[67].mxu1  ;;  %v2731_v47 = vadd.f32 %v2726_v29, %v4889_v14  ;;  %4023 = vmatprep.subr.bf16.mxu0 %v4312_v1 }
0x171a   : > { %v2732_v10 = vsel %vm661_vm1, %v2731_v47, 0.0 }
0x171b   : > { %2733 = vadd.xlane.f32.xlu1 %v2732_v10 }
0x17a8   : > { %v2734_v12 = vpop.xlane.xlu1 %2733 }
0x17a9   : > { %v2735_v15 = vmul.f32 0.03125, %v2734_v12 }
0x17ab   : > { %v2736_v46 = vsub.f32 %v2731_v47, %v2735_v15 }
0x17ad   : > { %v2737_v20 = vmul.f32 %v2736_v46, %v2736_v46 }
0x17af   : > { %v2738_v22 = vsel %vm661_vm1, %v2737_v20, 0.0 }
0x17b0   : > { %2739 = vadd.xlane.f32.xlu0 %v2738_v22 }
0x183d   : > { %v2740_v14 = vpop.xlane.xlu0 %2739 }
0x183e   : > { %v2741_v19 = vmul.f32 0.03125, %v2740_v14 }
0x1840   : > { %v2742_v41 = vadd.f32 1e-05, %v2741_v19 }
0x1842   : > { %4226 = vrsqrt.f32 %v2742_v41 }
0x184c   : > { %v4227_v23 = vpop.eup %4226 }
0x184d   : > { %v2744_v25 = vmul.f32 %v4227_v23, %v2736_v46 }
0x184f   : > { %v2745_v28 = vmul.f32 %v2744_v25, %v4681_v42 }
0x1851   : > { %v5018_v33 = vadd.f32 %v2745_v28, %v4685_v44 }
0x1853   : > { %v2747_v3 = vpack.c.bf16 %v5018_v33, %v5018_v33 }
0x1855   : > { %4014 = vmatmul.mubr.msk.bf16.vlgmr.msra.gmra.mrb[64].mxu0 %vm661_vm1, %v2747_v3 }
0x1856   : > { %4024 = vmatpush3.bf16.xpose.msra.mxu0 %v4697_v49  ;;  %4025 = vmatprep.mubr.msk.bf16.mxu0 %vm4313_vm0, %v4312_v1 }
0x1857   : > { %4035 = vmatprep.subr.bf16.mxu0 %v4312_v1 }
0x1928   : > { %v2808_v35 = vpop.f32.mrb[64].mxu0 }
0x1929   : > { %v2809_v39 = vadd.f32 %v4707_v36, %v2808_v35  ;;  %v4015_v40 = vpop.f32.mrb[65].mxu0 }
0x192a   : > { %v2811_v42 = vpop.f32.mrb[66].mxu0 }
0x192b   : > { %v2814_v16 = vpack.c.bf16 %v2809_v39, %v2809_v39  ;;  %v4016_v44 = vpop.f32.mrb[67].mxu0 }
0x192d   : > { %2818 = vrot.lane.b32.xlu1 %v2814_v16, %s5242_s20  ;;  %2816 = vrot.lane.b32.xlu0 %v2814_v16, %s5243_s28  ;;  %s5137_s28 = scalar_lea.hbm %s5199_s19, %s3679_s0 }
0x192e   : > { %4020 = vmatmul.mubr.msk.bf16.vlgmr.msra.gmra.mrb[68].mxu1 %vm790_vm2, %v2814_v16 }
0x192f   : > { %4030 = vmatpush3.bf16.xpose.msra.mxu1 %v4716_v57  ;;  %4031 = vmatprep.mubr.msk.bf16.mxu1 %vm4313_vm0, %v4312_v1 }
0x1930   : > { %4041 = vmatprep.subr.bf16.mxu1 %v4312_v1 }
0x1931   : > { %2820 = vrot.lane.b32.xlu1 %v2814_v16, %s5244_s6 }
0x199f   : > { %v2819_v49 = vpop.permute.xlu1 %2818  ;;  %v2817_v36 = vpop.permute.xlu0 %2816 }
0x19a0   : > { %4026 = vmatmul.mubr.msk.bf16.vlgmr.msra.gmra.mrb[68].mxu0 %vm790_vm2, %v2817_v36  ;;  %4032 = vmatmul.mubr.msk.bf16.vlgmr.msra.gmra.mrb[72].mxu1 %vm790_vm2, %v2819_v49 }
0x19a1   : > { %4036 = vmatpush3.bf16.xpose.msra.mxu0 %v4728_v61  ;;  %4042 = vmatpush3.bf16.msra.mxu1 %v4753_v53 }
0x19a2   : > { %4037 = vmatprep.mubr.msk.bf16.mxu0 %vm4313_vm0, %v4312_v1  ;;  %4047 = vmatprep.subr.bf16.mxu0 %v4312_v1 }
0x19a3   : > { %4043 = vmatprep.mubr.msk.bf16.mxu1 %vm4313_vm0, %v4312_v1  ;;  %4053 = vmatprep.subr.bf16.mxu1 %v4312_v1  ;;  %v2821_v57 = vpop.permute.xlu1 %2820 }
0x19a8   : > { %4038 = vmatmul.mubr.msk.bf16.vlgmr.msra.gmra.mrb[72].mxu0 %vm790_vm2, %v2821_v57 }
0x19a9   : > { %4048 = vmatpush3.bf16.msra.mxu0 %v4775_v18  ;;  %4049 = vmatprep.mubr.msk.bf16.mxu0 %vm4313_vm0, %v4312_v1 }
0x19aa   : > { %4059 = vmatprep.subr.bf16.mxu0 %v4312_v1 }
0x1a01   : > { %v2859_v61 = vpop.f32.mrb[68].mxu1 }
0x1a02   : > { %v2994_v53 = vmul.f32 0.35355338, %v2859_v61  ;;  %v4021_v43 = vpop.f32.mrb[69].mxu1 }
0x1a03   : > { %v2862_v45 = vpop.f32.mrb[70].mxu1 }
0x1a04   : > { %v4022_v48 = vpop.f32.mrb[71].mxu1  ;;  %v2998_v50 = vadd.f32 %v2994_v53, %v4575_v37 }
0x1a06   : > { %v3002_v52 = vsel %vm790_vm2, %v2998_v50, -inf }
0x1a07   : > { %3003 = vmax.xlane.f32.xlu0 %v3002_v52 }
0x1a73   : > { %v2902_v26 = vpop.f32.mrb[68].mxu0  ;;  %v2945_v13 = vpop.f32.mrb[72].mxu1 }
0x1a74   : > { %v2995_v55 = vmul.f32 0.35355338, %v2902_v26  ;;  %v2996_v56 = vmul.f32 0.35355338, %v2945_v13  ;;  %v4027_v18 = vpop.f32.mrb[69].mxu0  ;;  %v4033_v59 = vpop.f32.mrb[73].mxu1 }
0x1a75   : > { %v2905_v60 = vpop.f32.mrb[70].mxu0  ;;  %v2948_v62 = vpop.f32.mrb[74].mxu1 }
0x1a76   : > { %v4028_v63 = vpop.f32.mrb[71].mxu0  ;;  %v4034_v2 = vpop.f32.mrb[75].mxu1  ;;  %v2999_v4 = vadd.f32 %v2995_v55, %v4575_v37  ;;  %v3000_v5 = vadd.f32 %v2996_v56, %v4575_v37  ;;  %v4164_v60 = vld [vmem:[%s5191_s11] sm:$0xff]   ;;  %v4165_v62 = vld [vmem:[%s5191_s11 + $0x8] sm:$0xff]  }
0x1a78   : > { %v3005_v6 = vsel %vm790_vm2, %v2999_v4, -inf  ;;  %v3008_v7 = vsel %vm790_vm2, %v3000_v5, -inf }
0x1a79   : > { %3006 = vmax.xlane.f32.xlu1 %v3005_v6  ;;  %3009 = vmax.xlane.f32.xlu0 %v3008_v7 }
0x1a7b   : > { %v2988_v8 = vpop.f32.mrb[72].mxu0 }
0x1a7c   : > { %v2997_v9 = vmul.f32 0.35355338, %v2988_v8  ;;  %v4039_v29 = vpop.f32.mrb[73].mxu0 }
0x1a7d   : > { %v2991_v32 = vpop.f32.mrb[74].mxu0 }
0x1a7e   : > { %v4040_v54 = vpop.f32.mrb[75].mxu0  ;;  %v3001_v31 = vadd.f32 %v2997_v9, %v4575_v37 }
0x1a80   : > { %v3011_v47 = vsel %vm790_vm2, %v3001_v31, -inf }
0x1a81   : > { %3012 = vmax.xlane.f32.xlu0 %v3011_v47 }
0x1a94   : > { %v3004_v10 = vpop.xlane.xlu0 %3003 }
0x1a95   : > { %v3014_v12 = vsub.f32 %v2998_v50, %v3004_v10 }
0x1a97   : > { %v3018_v15 = vmul.f32 1.442695, %v3014_v12 }
0x1a99   : > { %4228 = vpow2.f32 %v3018_v15 }
0x1aa3   : > { %v4229_v46 = vpop.eup %4228 }
0x1aa4   : > { %v3026_v20 = vsel %vm790_vm2, %v4229_v46, 0.0 }
0x1aa5   : > { %3027 = vadd.xlane.f32.xlu1 %v3026_v20 }
0x1b06   : > { %v3007_v22 = vpop.xlane.xlu1 %3006  ;;  %v3010_v34 = vpop.xlane.xlu0 %3009 }
0x1b07   : > { %v3015_v21 = vsub.f32 %v2999_v4, %v3007_v22  ;;  %v3016_v14 = vsub.f32 %v3000_v5, %v3010_v34 }
0x1b09   : > { %v3020_v19 = vmul.f32 1.442695, %v3015_v21  ;;  %v3022_v41 = vmul.f32 1.442695, %v3016_v14 }
0x1b0b   : > { %4230 = vpow2.f32 %v3020_v19 }
0x1b0c   : > { %4232 = vpow2.f32 %v3022_v41 }
0x1b0e   : > { %v3013_v37 = vpop.xlane.xlu0 %3012 }
0x1b0f   : > { %v3017_v23 = vsub.f32 %v3001_v31, %v3013_v37 }
0x1b11   : > { %v3024_v25 = vmul.f32 1.442695, %v3017_v23 }
0x1b13   : > { %4234 = vpow2.f32 %v3024_v25 }
0x1b15   : > { %v4231_v28 = vpop.eup %4230 }
0x1b16   : > { %v4233_v3 = vpop.eup %4232  ;;  %v3029_v35 = vsel %vm790_vm2, %v4231_v28, 0.0 }
0x1b17   : > { %3030 = vadd.xlane.f32.xlu0 %v3029_v35  ;;  %v3032_v39 = vsel %vm790_vm2, %v4233_v3, 0.0 }
0x1b18   : > { %3033 = vadd.xlane.f32.xlu1 %v3032_v39 }
0x1b1d   : > { %v4235_v40 = vpop.eup %4234 }
0x1b1e   : > { %v3035_v42 = vsel %vm790_vm2, %v4235_v40, 0.0 }
0x1b1f   : > { %3036 = vadd.xlane.f32.xlu0 %v3035_v42  ;;  %v4169_v42 = vld [vmem:[%s5195_s15 + $0x8] sm:$0xff]  }
0x1b32   : > { %v3028_v16 = vpop.xlane.xlu1 %3027 }
0x1b33   : > { %4236 = vrcp.f32 %v3028_v16 }
0x1b3d   : > { %v4237_v44 = vpop.eup %4236 }
0x1b3e   : > { %v3042_v49 = vmul.f32 %v4237_v44, %v4229_v46 }
0x1b40   : > { %v3046_v36 = vpack.c.bf16 %v3042_v49, %v3042_v49 }
0x1b42   : > { %4044 = vmatmul.mubr.msk.bf16.vlgmr.msra.gmra.mrb[76].mxu1 %vm790_vm2, %v3046_v36 }
0x1b43   : > { %4054 = vmatpush3.bf16.msra.mxu1 %v4770_v58  ;;  %4055 = vmatprep.mubr.msk.bf16.mxu1 %vm4313_vm0, %v4312_v1 }
0x1b44   : > { %4065 = vmatprep.subr.bf16.mxu1 %v4312_v1 }
0x1ba4   : > { %v3031_v57 = vpop.xlane.xlu0 %3030 }
0x1ba5   : > { %v3034_v61 = vpop.xlane.xlu1 %3033  ;;  %4238 = vrcp.f32 %v3031_v57 }
0x1ba6   : > { %4240 = vrcp.f32 %v3034_v61 }
0x1bac   : > { %v3037_v53 = vpop.xlane.xlu0 %3036 }
0x1bad   : > { %4242 = vrcp.f32 %v3037_v53 }
0x1baf   : > { %v4239_v43 = vpop.eup %4238 }
0x1bb0   : > { %v4241_v45 = vpop.eup %4240  ;;  %v3043_v48 = vmul.f32 %v4239_v43, %v4231_v28 }
0x1bb1   : > { %v3044_v50 = vmul.f32 %v4241_v45, %v4233_v3  ;;  %v4170_v45 = vld [vmem:[%s5195_s15 + $0x10] sm:$0xff]  }
0x1bb2   : > { %v3047_v52 = vpack.c.bf16 %v3043_v48, %v3043_v48  ;;  %v4171_v48 = vld [vmem:[%s5195_s15 + $0x18] sm:$0xff]  }
0x1bb3   : > { %v3048_v26 = vpack.c.bf16 %v3044_v50, %v3044_v50 }
0x1bb4   : > { %4050 = vmatmul.mubr.msk.bf16.vlgmr.msra.gmra.mrb[76].mxu0 %vm790_vm2, %v3047_v52 }
0x1bb5   : > { %4056 = vmatmul.mubr.msk.bf16.vlgmr.msra.gmra.mrb[80].mxu1 %vm790_vm2, %v3048_v26  ;;  %4060 = vmatpush3.bf16.msra.mxu0 %v4781_v24 }
0x1bb6   : > { %4061 = vmatprep.mubr.msk.bf16.mxu0 %vm4313_vm0, %v4312_v1  ;;  %4069 = vmatprep.mubr.msk.bf16.mxu1 %vm4313_vm0, %v4312_v1 }
0x1bb7   : > { %v4243_v58 = vpop.eup %4242  ;;  %4073 = vmatprep.subr.bf16.mxu0 %v4312_v1  ;;  %4066 = vmatpush3.bf16.msra.mxu1 %v4164_v60 }
0x1bb8   : > { %v3045_v13 = vmul.f32 %v4243_v58, %v4235_v40  ;;  %4067 = vmatprep.subr.bf16.mxu1 %v4312_v1  ;;  %v4166_v40 = vld [vmem:[%s5193_s13] sm:$0xff]  }
0x1bba   : > { %v3049_v55 = vpack.c.bf16 %v3045_v13, %v3045_v13 }
0x1bbb   : > { %4068 = vmatpush3.bf16.msra.mxu1 %v4165_v62 }
0x1bbc   : > { %4062 = vmatmul.mubr.msk.bf16.vlgmr.msra.gmra.mrb[80].mxu0 %vm790_vm2, %v3049_v55  ;;  %4081 = vmatprep.subr.bf16.mxu1 %v4312_v1 }
0x1bbd   : > { %4077 = vmatprep.mubr.msk.bf16.mxu0 %vm4313_vm0, %v4312_v1  ;;  %4074 = vmatpush3.bf16.msra.mxu0 %v4166_v40 }
0x1bbe   : > { %4075 = vmatprep.subr.bf16.mxu0 %v4312_v1 }
0x1c15   : > { %v3087_v56 = vpop.f32.mrb[76].mxu1 }
0x1c16   : > { %v4045_v18 = vpop.f32.mrb[77].mxu1 }
0x1c17   : > { %v3090_v59 = vpop.f32.mrb[78].mxu1 }
0x1c18   : > { %v4046_v24 = vpop.f32.mrb[79].mxu1 }
0x1c87   : > { %v3130_v63 = vpop.f32.mrb[76].mxu0 }
0x1c88   : > { %v3173_v2 = vpop.f32.mrb[80].mxu1  ;;  %3223 = vrot.lane.b32.xlu1 %v3130_v63, %s5240_s2  ;;  %v4051_v4 = vpop.f32.mrb[77].mxu0  ;;  %s615_s2 = sand.u32 1, %s4302_s30  }
0x1c89   : > { %3227 = vrot.lane.b32.xlu0 %v3173_v2, %s5239_s24  ;;  %v4057_v5 = vpop.f32.mrb[81].mxu1  ;;  %v3133_v6 = vpop.f32.mrb[78].mxu0  ;;  %s3489_s6 = scalar_lea.sflag [#allocation3], %s615_s2  ;;  %s4252_s24 = sshll.u32 %s4322_s25, 4  ;;  %s4253_s24 = int_to_ptr.vmem [resolvable:$false] %s4252_s24 }
0x1c8a   : > { %v3176_v7 = vpop.f32.mrb[82].mxu1  ;;  %v4052_v8 = vpop.f32.mrb[79].mxu0 }
0x1c8b   : > { %v4058_v9 = vpop.f32.mrb[83].mxu1 }
0x1c8f   : > { %v3216_v29 = vpop.f32.mrb[80].mxu0 }
0x1c90   : > { %3231 = vrot.lane.b32.xlu1 %v3216_v29, %s5241_s23  ;;  %v4063_v32 = vpop.f32.mrb[81].mxu0  ;;  %s3586_s23 = sshll.u32 %s615_s2, 3 }
0x1c91   : > { %v3219_v54 = vpop.f32.mrb[82].mxu0  ;;  %s617_s26 = scalar_lea.vmem [#allocation2], %s3586_s23  ;;  %s4254_s23 = scalar_lea.vmem %s4253_s24, 256 }
0x1c92   : > { %v4064_v31 = vpop.f32.mrb[83].mxu0  ;;  %s3502_s27 = sshll.u32 %s617_s26, 4  ;;  %s5139_s27 = int_to_ptr.vmem [resolvable:$true] %s3502_s27 }
0x1c93   : > { %s4248_s1 = scalar_lea.vmem %s5139_s27, 128  ;;  %p4255_p0 = scmp.lt.s32.totalorder %s5139_s27, %s4253_s24 }
0x1c94   : > { %p4249_p11 = scmp.ne.s32.totalorder %s5139_s27, %s4248_s1  ;;  %p4256_p1 = scmp.lt.s32.totalorder %s4254_s23, %s4248_s1 }
0x1c96   : > { %p4250_p12 = pnand %p4249_p11, %p4461_p5  ;;  %p4257_p2 = por %p4256_p1, %p4255_p0 }
0x1c98   : > { %p4251_p13 = pneg %p4250_p12 }
0x1c9a   : > { %p4258_p3 = pnand %p4257_p2, %p4251_p13 }
0x1cfa   : > { %v3224_v47 = vpop.permute.xlu1 %3223 }
0x1cfb   : > { %v3234_v10 = vsel %vm790_vm2, %v3087_v56, %v3224_v47  ;;  %v3228_v12 = vpop.permute.xlu0 %3227 }
0x1cfc   : > { %v3235_v15 = vsel %vm1249_vm4, %v3234_v10, %v3228_v12 }
0x1d02   : > { %v3232_v46 = vpop.permute.xlu1 %3231 }
0x1d03   : > { %v3236_v20 = vsel %vm1251_vm5, %v3235_v15, %v3232_v46 }
0x1d04   : > { %v3237_v22 = vpack.c.bf16 %v3236_v20, %v3236_v20 }
0x1d06   : > { %4070 = vmatmul.mubr.msk.bf16.vlgmr.msra.gmra.mrb[84].mxu1 %vm661_vm1, %v3237_v22 }
0x1d07   : > { %4089 = vmatprep.mubr.msk.bf16.mxu1 %vm4313_vm0, %v4312_v1 }
0x1dd9   : > { %v3298_v34 = vpop.f32.mrb[84].mxu1 }
0x1dda   : > { %v3299_v21 = vadd.f32 %v4813_v0, %v3298_v34  ;;  %v4071_v14 = vpop.f32.mrb[85].mxu1  ;;  %v4167_v0 = vld [vmem:[%s5193_s13 + $0x8] sm:$0xff]  }
0x1ddb   : > { %v3301_v19 = vpop.f32.mrb[86].mxu1  ;;  %4076 = vmatpush3.bf16.msra.mxu0 %v4167_v0 }
0x1ddc   : > { %v4072_v41 = vpop.f32.mrb[87].mxu1  ;;  %v3304_v37 = vadd.f32 %v3299_v21, %v5018_v33  ;;  %v4168_v33 = vld [vmem:[%s5195_s15] sm:$0xff]  }
0x1ddd   : > { %4082 = vmatpush3.bf16.msra.mxu1 %v4168_v33 }
0x1dde   : > { %v3305_v23 = vsel %vm661_vm1, %v3304_v37, 0.0  ;;  %4083 = vmatprep.subr.bf16.mxu1 %v4312_v1 }
0x1ddf   : > { %3306 = vadd.xlane.f32.xlu1 %v3305_v23 }
0x1de1   : > { %4084 = vmatpush3.bf16.msra.mxu1 %v4169_v42 }
0x1de2   : > { %4085 = vmatprep.subr.bf16.mxu1 %v4312_v1 }
0x1de5   : > { %4086 = vmatpush3.bf16.msra.mxu1 %v4170_v45 }
0x1de6   : > { %4087 = vmatprep.subr.bf16.mxu1 %v4312_v1 }
0x1de9   : > { %4088 = vmatpush3.bf16.msra.mxu1 %v4171_v48 }
0x1e6c   : > { %v3307_v25 = vpop.xlane.xlu1 %3306 }
0x1e6d   : > { %v3308_v28 = vmul.f32 0.03125, %v3307_v25 }
0x1e6f   : > { %v3309_v3 = vsub.f32 %v3304_v37, %v3308_v28 }
0x1e71   : > { %v3310_v35 = vmul.f32 %v3309_v3, %v3309_v3 }
0x1e73   : > { %v3311_v39 = vsel %vm661_vm1, %v3310_v35, 0.0 }
0x1e74   : > { %3312 = vadd.xlane.f32.xlu0 %v3311_v39 }
0x1f01   : > { %v3313_v16 = vpop.xlane.xlu0 %3312 }
0x1f02   : > { %v3314_v44 = vmul.f32 0.03125, %v3313_v16 }
0x1f04   : > { %v3315_v49 = vadd.f32 1e-05, %v3314_v44 }
0x1f06   : > { %4244 = vrsqrt.f32 %v3315_v49 }
0x1f10   : > { %v4245_v36 = vpop.eup %4244 }
0x1f11   : > { %v3317_v57 = vmul.f32 %v4245_v36, %v3309_v3 }
0x1f13   : > { %v3318_v61 = vmul.f32 %v3317_v57, %v4837_v27 }
0x1f15   : > { %v3319_v53 = vadd.f32 %v3318_v61, %v4840_v30 }
0x1f17   : > { %v3320_v43 = vpack.c.bf16 %v3319_v53, %v3319_v53 }
0x1f19   : > { %4078 = vmatmul.mubr.msk.bf16.vlgmr.msra.gmra.mrb[84].mxu0 %vm661_vm1, %v3320_v43 }
0x1fec   : > { %v3381_v50 = vpop.f32.mrb[84].mxu0 }
0x1fed   : > { %v3382_v27 = vadd.f32 %v4858_v38, %v3381_v50  ;;  %v4079_v52 = vpop.f32.mrb[85].mxu0 }
0x1fee   : > { %v3384_v30 = vpop.f32.mrb[86].mxu0 }
0x1fef   : > { %v3387_v26 = vmax.f32 %v3382_v27, 0.0  ;;  %v4080_v58 = vpop.f32.mrb[87].mxu0 }
0x1ff1   : > { %v3388_v13 = vpack.c.bf16 %v3387_v26, %v3387_v26 }
0x1ff3   : > { %4090 = vmatmul.mubr.msk.bf16.vlgmr.msra.gmra.mrb[88].mxu1 %vm2066_vm6, %v3388_v13 }
0x20c6   : > { %v3465_v55 = vpop.f32.mrb[88].mxu1 }
0x20c7   : > { %v3466_v56 = vadd.f32 %v4867_v51, %v3465_v55  ;;  %v4091_v18 = vpop.f32.mrb[89].mxu1 }
0x20c8   : > { %v3468_v1 = vpop.f32.mrb[90].mxu1 }
0x20c9   : > { %v4092_v59 = vpop.f32.mrb[91].mxu1  ;;  %v3471_v24 = vadd.f32 %v3466_v56, %v3319_v53 }
0x20cb   : > { %v3472_v60 = vsel %vm661_vm1, %v3471_v24, 0.0 }
0x20cc   : > { %3473 = vadd.xlane.f32.xlu0 %v3472_v60 }
0x2159   : > { %v3474_v38 = vpop.xlane.xlu0 %3473 }
0x215a   : > { %v3475_v62 = vmul.f32 0.03125, %v3474_v38 }
0x215c   : > { %v3476_v63 = vsub.f32 %v3471_v24, %v3475_v62 }
0x215e   : > { %v3477_v2 = vmul.f32 %v3476_v63, %v3476_v63 }
0x2160   : > { %v3478_v4 = vsel %vm661_vm1, %v3477_v2, 0.0 }
0x2161   : > { %3479 = vadd.xlane.f32.xlu1 %v3478_v4 }
0x21ee   : > { %v3480_v5 = vpop.xlane.xlu1 %3479 }
0x21ef   : > { %v3481_v6 = vmul.f32 0.03125, %v3480_v5 }
0x21f1   : > { %v3482_v7 = vadd.f32 1e-05, %v3481_v6 }
0x21f3   : > { %4246 = vrsqrt.f32 %v3482_v7 }
0x21fd   : > { %v4247_v51 = vpop.eup %4246 }
0x21fe   : > { %v3484_v8 = vmul.f32 %v4247_v51, %v3476_v63 }
0x2200   : > { %v3485_v9 = vmul.f32 %v3484_v8, %v4882_v11 }
0x2202   : > { %v3486_v29 = vadd.f32 %v3485_v9, %v4885_v17 }
0x2204   : > { %3487 = vst.msk [vmem:[%s617_s26] sm:$0xff] %vm661_vm1, %v3486_v29 }
0x2205   : > { %4261 = shalt.err (!%p4258_p3)
}
0x2206   : > { %s4262_s2 = scalar_lea.hbm %s5137_s28, 128  ;;  %s4266_s22 = scalar_lea.hbm %s5199_s19, 256 }
0x2207   : > { %p4263_p4 = scmp.ne.s32.totalorder %s5137_s28, %s4262_s2  ;;  %p4267_p9 = scmp.lt.u32.totalorder %s5137_s28, %s5199_s19 }
0x2208   : > { %p4268_p10 = scmp.lt.u32.totalorder %s4266_s22, %s4262_s2  ;;  %p4270_p12 = scmp.lt.u32.totalorder %s4262_s2, %s5137_s28 }
0x2209   : > { %p4264_p7 = pnand %p4263_p4, %p4461_p5 }
0x220a   : > { %p4269_p11 = por %p4268_p10, %p4267_p9 }
0x220b   : > { %p4265_p8 = pneg %p4264_p7 }
0x220c   : > { %p4271_p13 = por %p4270_p12, %p4269_p11 }
0x220e   : > { %p4272_p0 = pnand %p4271_p13, %p4265_p8 }
0x2210   : > { %4275 = shalt.err (!%p4272_p0)
}
0x2211   : > { %4093 = dma.vmem_to_hbm [thread:$0]  (%p4461_p5), %s5139_s27, 128, %s5137_s28, %s3489_s6  }
0x2212 PF: > { %s5247_s1 = sld [smem:[#allocation5_spill]]  ;;  %p4099_p1 = scmp.ge.s32.totalorder %s4310_s21, 2 }
0x2214   : > { %p4096_p2 = pnand %p4099_p1, %p4465_p6 }
0x2218   : > { %s3514_s23 = sand.u32 1, %s5247_s1  }
0x2219   : > { %s3515_s0 = scalar_lea.sflag [#allocation3], %s3514_s23 }
0x221a   : > { %4293 = dma.done.wait (!%p4096_p2), %s3515_s0, 128  }
0x221b   : > { %4295 = vsyncadd (!%p4096_p2), %s3515_s0, 4294967168  ;;  %s5249_s21 = sld [smem:[#allocation7_spill]]  ;;  %s5250_s2 = sld [smem:[#allocation6_spill]] }
0x221c   : > { %s5251_s20 = sld [smem:[#allocation8_spill]]  ;;  %s5252_s0 = smov %s4302_s30 }
0x2221   : > { %p29_p3 = scmp.ge.s32.totalorder %s5249_s21, 4   ;;  %s5253_s30 = smov %s5250_s2 }
0x2223   :  { %31 = sbr.rel (!%p29_p3) target bundleno = 9 (0x9), region = 137 }
0x222a   :  { %3520 = vsyncpa [#allocation3], 1 }
0x222b   :  { %3522 = vsyncpa [#allocation3 + $0x1], 1 }

</bundles_post_ra>
